<compile_context>
chip_gen: v7x
topology: tpu7x:2x2x1
jax: 0.10.0
libtpu: 0.0.40
codegen_flags: <defaults>
</compile_context>

<pallas_src>
import numpy as np
import jax
import jax.numpy as jnp
from jax import lax
from jax.experimental import pallas as pl
from jax.experimental.pallas import tpu as pltpu

LN_EPS = 1e-5
MATMUL_DTYPE = jnp.bfloat16          # MXU operand dtype (f32 accumulation everywhere)
VMEM_LIMIT = 64 * 1024 * 1024        # raise scoped VMEM budget (<= physical on v5e/v6e/v7x)


def _ln(x, gamma):
    """Row LayerNorm (bias=False); statistics and output in f32."""
    x = x.astype(jnp.float32)
    mu = jnp.mean(x, axis=-1, keepdims=True)
    xc = x - mu
    var = jnp.mean(xc * xc, axis=-1, keepdims=True)
    return xc * lax.rsqrt(var + LN_EPS) * gamma


# ---------------- kernel A: ln_1 -> ln_stu1 -> stacked Toeplitz delta -> ln_stu2
def _ln_delta_kernel(xt_ref, xs_ref, g1_ref, g2_ref, g3_ref, t_ref, r_ref,
                     xz_ref, dln_ref, acc_ref, sstk_ref):
    # xt_ref: [tl, D] rows of x for this t-block; xs_ref: [ts, D] rows for this s-block.
    # t_ref: [C, tl, ts] bf16 folded Toeplitz filters (spectral + AR shifts).
    # r_ref: [C*D, D] bf16 stacked right weights [m_phi ; m_u^T].
    si = pl.program_id(2)
    C = t_ref.shape[0]
    D = xs_ref.shape[-1]

    @pl.when(si == 0)
    def _():
        acc_ref[...] = jnp.zeros_like(acc_ref)
        xt = xt_ref[...].astype(jnp.float32)
        # partial residual x + ln_1(x), kept f32 on the residual stream
        xz_ref[...] = (xt + _ln(xt, g1_ref[...])).astype(xz_ref.dtype)

    # u for this s-block: STU.ln_1(STUBlock.ln_1(x)); recomputed per (t, s) — cheap VPU.
    us = _ln(_ln(xs_ref[...], g1_ref[...]), g2_ref[...]).astype(sstk_ref.dtype)

    # One [tl, ts] @ [ts, D] matmul per folded channel into lane slab c of the scratch...
    for c in range(C):                                    # static unroll, C = K + k_u small
        sstk_ref[:, c * D:(c + 1) * D] = jnp.dot(
            t_ref[c], us, preferred_element_type=jnp.float32).astype(sstk_ref.dtype)

    # ...then ONE long-reduction stacked matmul keeps the MXU full (review item).
    acc_ref[...] += jnp.dot(sstk_ref[...], r_ref[...],
                            preferred_element_type=jnp.float32)

    @pl.when(si == pl.num_programs(2) - 1)
    def _():
        # STU.ln_2 folded here so kernel B reads an already-normalized bf16 delta.
        dln_ref[...] = _ln(acc_ref[...], g3_ref[...]).astype(dln_ref.dtype)


# ---------------- kernel B: y_t recurrence -> x1 = x + z + y
def _yt_res_kernel(dln_ref, xz_ref, my_ref, o_ref, dln_s, ys_s, carry_s):
    # dln_ref/xz_ref/o_ref: [TB, TC, D]; my_ref: [k_y, D, D] bf16.
    # dln_s/ys_s: time-major VMEM scratch [TC, TB, D]; carry_s: [k_y, TB, D] carries the
    # recurrence state across the 'arbitrary' time-chunk grid axis.
    c = pl.program_id(1)
    TB, TC, D = dln_ref.shape
    k_y = my_ref.shape[0]

    @pl.when(c == 0)
    def _():
        carry_s[...] = jnp.zeros_like(carry_s)

    # Single relayout to time-major instead of per-row strided stores (review item).
    dln_s[...] = pltpu.einshape("btd->tbd", dln_ref[...].astype(jnp.float32))

    myw = [my_ref[j] for j in range(k_y)]                 # per-j [D, D] weight slices
    carry0 = tuple(carry_s[j] for j in range(k_y))        # values, no lane concat in loop

    def step(t, carry):
        y = dln_s[t]                                      # [TB, D] f32
        for j in range(k_y):                              # static, k_y small
            y = y + jnp.dot(carry[j].astype(myw[j].dtype), myw[j],
                            preferred_element_type=jnp.float32)
        ys_s[t] = y
        return (y,) + carry[:k_y - 1]                     # rotate carried values only

    final = lax.fori_loop(0, TC, step, carry0)
    for j in range(k_y):                                  # persist carry to next chunk
        carry_s[j] = final[j]

    y_bt = pltpu.einshape("tbd->btd", ys_s[...])
    o_ref[...] = (y_bt + xz_ref[...].astype(jnp.float32)).astype(o_ref.dtype)


# ---------------- kernel C: ln_2 -> SwiGLU (H on an 'arbitrary' grid axis) -> residual
def _ln_swiglu_res_kernel(x_ref, g_ref, w1_ref, w2_ref, w3_ref, o_ref, acc_ref):
    # x_ref/o_ref: [TM, D]; w1/w2 blocks: [D, TH] bf16; w3 block: [TH, D] bf16.
    h = pl.program_id(1)
    x = x_ref[...].astype(jnp.float32)

    @pl.when(h == 0)
    def _():
        acc_ref[...] = x                                  # residual: x1 + FFN(ln(x1))

    hid = _ln(x, g_ref[...]).astype(w1_ref.dtype)
    a = jnp.dot(hid, w1_ref[...], preferred_element_type=jnp.float32)
    b = jnp.dot(hid, w2_ref[...], preferred_element_type=jnp.float32)
    s = (a * jax.nn.sigmoid(a)) * b                       # SiLU(a) * b in f32
    acc_ref[...] += jnp.dot(s.astype(w3_ref.dtype), w3_ref[...],
                            preferred_element_type=jnp.float32)

    @pl.when(h == pl.num_programs(1) - 1)
    def _():
        o_ref[...] = acc_ref[...].astype(o_ref.dtype)


# ------------------------------------------------------------ full STUBlock forward
def stu_block_forward(x, kp):
    B, L, D = x.shape
    C = kp["t_all"].shape[0]
    CD = kp["right_all"].shape[0]
    k_y = kp["m_y_j"].shape[0]
    H = kp["w1"].shape[1]
    mm_dtype = kp["t_all"].dtype

    # ---- tile sizes (toy shapes take the full extent; production: 128/256 multiples)
    tl = min(L, 256)                      # delta row tile
    ts = min(L, 256)                      # reduction (s) tile
    TC = min(L, 256)                      # recurrence time chunk
    TB = min(B, 128)                      # recurrence batch rows per step (MXU M fill)
    n_t, n_s = pl.cdiv(L, tl), pl.cdiv(L, ts)

    # ---- A: fused LNs + stacked spectral/AR delta (+ partial residual x+z)
    xz, dln = pl.pallas_call(
        _ln_delta_kernel,
        out_shape=(jax.ShapeDtypeStruct((B, L, D), jnp.float32),
                   jax.ShapeDtypeStruct((B, L, D), mm_dtype)),
        grid=(B, n_t, n_s),
        in_specs=[pl.BlockSpec((None, tl, D), lambda b, t, s: (b, t, 0)),
                  pl.BlockSpec((None, ts, D), lambda b, t, s: (b, s, 0)),
                  pl.BlockSpec((1, D), lambda b, t, s: (0, 0)),
                  pl.BlockSpec((1, D), lambda b, t, s: (0, 0)),
                  pl.BlockSpec((1, D), lambda b, t, s: (0, 0)),
                  pl.BlockSpec((C, tl, ts), lambda b, t, s: (0, t, s)),
                  pl.BlockSpec((CD, D), lambda b, t, s: (0, 0))],
        out_specs=(pl.BlockSpec((None, tl, D), lambda b, t, s: (b, t, 0)),
                   pl.BlockSpec((None, tl, D), lambda b, t, s: (b, t, 0))),
        scratch_shapes=[pltpu.VMEM((tl, D), jnp.float32),
                        pltpu.VMEM((tl, C * D), mm_dtype)],
        compiler_params=pltpu.CompilerParams(
            dimension_semantics=("parallel", "parallel", "arbitrary"),
            vmem_limit_bytes=VMEM_LIMIT),
    )(x, x, kp["g_blk1"], kp["g_stu1"], kp["g_stu2"], kp["t_all"], kp["right_all"])

    # ---- B: y_t recurrence (+ residual), time-chunked, carry held across chunks
    x1 = pl.pallas_call(
        _yt_res_kernel,
        out_shape=jax.ShapeDtypeStruct((B, L, D), jnp.float32),
        grid=(pl.cdiv(B, TB), pl.cdiv(L, TC)),
        in_specs=[pl.BlockSpec((TB, TC, D), lambda i, c: (i, c, 0)),
                  pl.BlockSpec((TB, TC, D), lambda i, c: (i, c, 0)),
                  pl.BlockSpec((k_y, D, D), lambda i, c: (0, 0, 0))],
        out_specs=pl.BlockSpec((TB, TC, D), lambda i, c: (i, c, 0)),
        scratch_shapes=[pltpu.VMEM((TC, TB, D), jnp.float32),
                        pltpu.VMEM((TC, TB, D), jnp.float32),
                        pltpu.VMEM((k_y, TB, D), jnp.float32)],
        compiler_params=pltpu.CompilerParams(
            dimension_semantics=("parallel", "arbitrary"),
            vmem_limit_bytes=VMEM_LIMIT),
    )(dln, xz, kp["m_y_j"])

    # ---- C: fused LN + SwiGLU (+ residual), rows 'parallel', hidden dim 'arbitrary'
    rows = B * L
    tm = min(256, rows)
    if rows >= 16 and rows // tm < 2:
        tm = max(8, ((rows // 2) // 8) * 8)               # >= 2 row tiles for megacore
    TH = H if H % 512 else 512                            # H chunk (prod: 128 multiple)
    x1f = x1.reshape(rows, D)
    out = pl.pallas_call(
        _ln_swiglu_res_kernel,
        out_shape=jax.ShapeDtypeStruct((rows, D), jnp.float32),
        grid=(pl.cdiv(rows, tm), pl.cdiv(H, TH)),
        in_specs=[pl.BlockSpec((tm, D), lambda i, h: (i, 0)),
                  pl.BlockSpec((1, D), lambda i, h: (0, 0)),
                  pl.BlockSpec((D, TH), lambda i, h: (0, h)),
                  pl.BlockSpec((D, TH), lambda i, h: (0, h)),
                  pl.BlockSpec((TH, D), lambda i, h: (h, 0))],
        out_specs=pl.BlockSpec((tm, D), lambda i, h: (i, 0)),
        scratch_shapes=[pltpu.VMEM((tm, D), jnp.float32)],
        compiler_params=pltpu.CompilerParams(
            dimension_semantics=("parallel", "arbitrary"),
            vmem_limit_bytes=VMEM_LIMIT),
    )(x1f, kp["g_blk2"], kp["w1"], kp["w2"], kp["w3"])

    # TODO(synk): nn.Dropout layers are identity here (p=0.0 / eval mode).
    # TODO(synk): on v7x, w1/w2/w3 could additionally be quantized to fp8 (bf16 activations).
    return out.reshape(B, L, D).astype(x.dtype)


# ---------------------------------------------------------- parameter setup
def build_params(key, L, D, K, k_u, k_y, H):
    # top-k eigendecomposition of the spectral Hankel matrix (host-side setup glue)
    i = np.arange(1, L + 1, dtype=np.float64)
    s = i[:, None] + i[None, :]
    Z = 2.0 / (s ** 3 - s)
    w, v = np.linalg.eigh(Z)
    eig_vals = w[-K:]                                     # [K]
    eig_vecs = v[:, -K:]                                  # [L, K]

    # learned parameters (deterministic init; torch.empty stand-in)
    ks = jax.random.split(key, 6)
    m_phi = 0.02 * jax.random.normal(ks[0], (K * D, D), jnp.float32)
    m_u   = 0.02 * jax.random.normal(ks[1], (D, D, k_u), jnp.float32)
    m_y   = 0.02 * jax.random.normal(ks[2], (D, k_y, D), jnp.float32)
    w1    = 0.02 * jax.random.normal(ks[3], (D, H), jnp.float32)
    w2    = 0.02 * jax.random.normal(ks[4], (D, H), jnp.float32)
    w3    = 0.02 * jax.random.normal(ks[5], (H, D), jnp.float32)

    # Fold causal spectral conv + eig_vals**0.25 scale + double time-shift into
    # Toeplitz matrices: T[k, t, s] = lam_k^0.25 * phi[t-2-s, k]  (0 if t-2-s < 0)
    t_idx = np.arange(L)[:, None]
    s_idx = np.arange(L)[None, :]
    d = t_idx - s_idx - 2
    valid = d >= 0
    dc = np.clip(d, 0, L - 1)
    T = eig_vecs[dc]                                      # [L, L, K]
    T = np.where(valid[:, :, None], T, 0.0)
    T = np.transpose(T, (2, 0, 1)) * (eig_vals ** 0.25)[:, None, None]   # [K, L, L]

    t_spec = jnp.asarray(T, jnp.float32)                  # spectral Toeplitz filters
    right_phi = m_phi.reshape(K, D, D)                    # m_phi chunks, k-major
    m_u_t = jnp.transpose(m_u, (2, 1, 0))                 # [k_u, D, D] = m_u[:,:,i].T
    m_y_flat = jnp.transpose(m_y, (1, 2, 0)).reshape(k_y * D, D)   # stacked m_y[:,j,:].T

    ones = jnp.ones((1, D), jnp.float32)                  # LayerNorm weight (bias=False)
    return dict(g_blk1=ones, g_stu1=ones, g_stu2=ones, g_blk2=ones,
                t_spec=t_spec, right_phi=right_phi, m_u_t=m_u_t,
                m_y_flat=m_y_flat, w1=w1, w2=w2, w3=w3)


def prepare_kernel_params(p, dtype=MATMUL_DTYPE):
    """Derive the kernel-side tensors: AR shifts folded into extra Toeplitz channels,
    right weights stacked for the single long-reduction matmul, bf16 matmul operands."""
    K, L, _ = p["t_spec"].shape
    k_u, D, _ = p["m_u_t"].shape
    k_y = p["m_y_flat"].shape[0] // D

    shifts = jnp.stack([jnp.eye(L, k=-i, dtype=jnp.float32) for i in range(k_u)])
    t_all = jnp.concatenate([p["t_spec"], shifts], axis=0).astype(dtype)      # [K+k_u, L, L]
    right_all = jnp.concatenate([p["right_phi"].reshape(K * D, D),
                                 p["m_u_t"].reshape(k_u * D, D)],
                                axis=0).astype(dtype)                         # [(K+k_u)*D, D]
    m_y_j = p["m_y_flat"].reshape(k_y, D, D).astype(dtype)

    return dict(g_blk1=p["g_blk1"], g_stu1=p["g_stu1"], g_stu2=p["g_stu2"],
                g_blk2=p["g_blk2"], t_all=t_all, right_all=right_all, m_y_j=m_y_j,
                w1=p["w1"].astype(dtype), w2=p["w2"].astype(dtype),
                w3=p["w3"].astype(dtype))


# --------------------------------------------------------- pure-JAX reference
def reference_forward(x, p, k_u, k_y):
    def ln(v, g):
        mu = v.mean(-1, keepdims=True)
        var = ((v - mu) ** 2).mean(-1, keepdims=True)
        return (v - mu) / jnp.sqrt(var + LN_EPS) * g

    B, L, D = x.shape
    z = ln(x, p["g_blk1"][0])
    u = ln(z, p["g_stu1"][0])
    spec = jnp.einsum("kts,bsd,kde->bte", p["t_spec"], u, p["right_phi"],
                      precision="highest")
    ar = jnp.zeros_like(spec)
    for i in range(k_u):
        u_sh = jnp.pad(u, ((0, 0), (i, 0), (0, 0)))[:, :L, :]
        ar = ar + jnp.einsum("btd,de->bte", u_sh, p["m_u_t"][i], precision="highest")
    delta = ln(spec + ar, p["g_stu2"][0])

    m_y_t = p["m_y_flat"].reshape(k_y, D, D)
    carry = jnp.zeros((B, k_y, D), jnp.float32)
    ys = []
    for t in range(L):
        out = delta[:, t] + jnp.einsum("bjd,jde->be", carry, m_y_t, precision="highest")
        carry = jnp.concatenate([out[:, None], carry[:, :k_y - 1]], axis=1)
        ys.append(out)
    y = jnp.stack(ys, axis=1)

    x1 = x + z + y
    h = ln(x1, p["g_blk2"][0])
    a = jnp.dot(h, p["w1"], precision="highest")
    b = jnp.dot(h, p["w2"], precision="highest")
    return x1 + jnp.dot(a * jax.nn.sigmoid(a) * b, p["w3"], precision="highest")


if __name__ == "__main__":
    B, L, D = 2, 8, 32            # batch, sl, n_embd (= d_out)
    K, K_U, K_Y = 4, 3, 2         # num_eigh, auto_reg_k_u, auto_reg_k_y
    SCALE = 3
    H = SCALE * D * 2 // 3        # SwiGLU hidden dim

    root = jax.random.PRNGKey(0)
    kx, kparam = jax.random.split(root)
    x = jax.random.normal(kx, (B, L, D), jnp.float32)
    params = build_params(kparam, L, D, K, K_U, K_Y, H)
    kernel_params = prepare_kernel_params(params)

    out = jax.jit(stu_block_forward)(x, kernel_params)
    out = jax.block_until_ready(out)

    ref = reference_forward(x, params, K_U, K_Y)
    assert out.shape == (B, L, D)
    if MATMUL_DTYPE == jnp.bfloat16:
        rtol, atol = 2e-2, 3e-2   # bf16 MXU operands (f32 accumulation / LN stats)
    else:
        rtol, atol = 1e-2, 1e-2
    np.testing.assert_allclose(np.asarray(out), np.asarray(ref), rtol=rtol, atol=atol)
    print("KERNEL_OK")
</pallas_src>

<mosaic_0001>
module attributes {stable_mosaic.version = 11 : i64} {
  func.func @_yt_res_kernel(%arg0: i32, %arg1: i32, %arg2: memref<2x8x32xbf16, #tpu.memory_space<vmem>>, %arg3: memref<2x8x32xf32, #tpu.memory_space<vmem>>, %arg4: memref<2x32x32xbf16, #tpu.memory_space<vmem>>, %arg5: memref<2x8x32xf32, #tpu.memory_space<vmem>>, %arg6: memref<8x2x32xf32, #tpu.memory_space<vmem>>, %arg7: memref<8x2x32xf32, #tpu.memory_space<vmem>>, %arg8: memref<2x2x32xf32, #tpu.memory_space<vmem>>) attributes {dimension_semantics = [#tpu.dimension_semantics<parallel>, #tpu.dimension_semantics<arbitrary>], iteration_bounds = array<i64: 1, 1>, scalar_prefetch = 0 : i64, scratch_operands = 3 : i64, tpu.core_type = #tpu.core_type<tc>, window_params = [{transform_indices = @transform_0, window_bounds = array<i64: 2, 8, 32>}, {transform_indices = @transform_1, window_bounds = array<i64: 2, 8, 32>}, {pipeline_mode = #tpu.pipeline_mode<synchronous>, transform_indices = @transform_2, window_bounds = array<i64: 2, 32, 32>}, {transform_indices = @transform_3, window_bounds = array<i64: 2, 8, 32>}]} {
    %c0_i32 = arith.constant 0 : i32
    %0 = arith.cmpi eq, %arg1, %c0_i32 : i32
    %1 = arith.extui %0 : i1 to i32
    %c0_i32_0 = arith.constant 0 : i32
    %2 = arith.cmpi ne, %1, %c0_i32_0 : i32
    scf.if %2 {
      %cst = arith.constant 0.000000e+00 : f32
      %28 = vector.broadcast %cst : f32 to vector<2x2x32xf32>
      %c0_34 = arith.constant 0 : index
      %c0_35 = arith.constant 0 : index
      %c0_36 = arith.constant 0 : index
      %29 = vector.load %arg8[%c0_34, %c0_35, %c0_36] : memref<2x2x32xf32, #tpu.memory_space<vmem>>, vector<2x2x32xf32>
      tpu.vector_store %arg8[%c0_34, %c0_35, %c0_36], %28 {strides = array<i32>} : memref<2x2x32xf32, #tpu.memory_space<vmem>>, vector<2x2x32xf32>,
    } else {
    }
    %c0 = arith.constant 0 : index
    %c0_1 = arith.constant 0 : index
    %c0_2 = arith.constant 0 : index
    %3 = vector.load %arg2[%c0, %c0_1, %c0_2] : memref<2x8x32xbf16, #tpu.memory_space<vmem>>, vector<2x8x32xbf16>
    %4 = arith.extf %3 : vector<2x8x32xbf16> to vector<2x8x32xf32>
    %5 = tpu.transpose %4, [1, 0, 2] : vector<2x8x32xf32> -> vector<8x2x32xf32>
    %c0_3 = arith.constant 0 : index
    %c0_4 = arith.constant 0 : index
    %c0_5 = arith.constant 0 : index
    %6 = vector.load %arg6[%c0_3, %c0_4, %c0_5] : memref<8x2x32xf32, #tpu.memory_space<vmem>>, vector<8x2x32xf32>
    tpu.vector_store %arg6[%c0_3, %c0_4, %c0_5], %5 {strides = array<i32>} : memref<8x2x32xf32, #tpu.memory_space<vmem>>, vector<8x2x32xf32>,
    %c0_6 = arith.constant 0 : index
    %c0_7 = arith.constant 0 : index
    %c0_8 = arith.constant 0 : index
    %7 = vector.load %arg4[%c0_6, %c0_7, %c0_8] : memref<2x32x32xbf16, #tpu.memory_space<vmem>>, vector<1x32x32xbf16>
    %8 = vector.shape_cast %7 : vector<1x32x32xbf16> to vector<32x32xbf16>
    %c1 = arith.constant 1 : index
    %c0_9 = arith.constant 0 : index
    %c0_10 = arith.constant 0 : index
    %9 = vector.load %arg4[%c1, %c0_9, %c0_10] : memref<2x32x32xbf16, #tpu.memory_space<vmem>>, vector<1x32x32xbf16>
    %10 = vector.shape_cast %9 : vector<1x32x32xbf16> to vector<32x32xbf16>
    %c0_11 = arith.constant 0 : index
    %c0_12 = arith.constant 0 : index
    %c0_13 = arith.constant 0 : index
    %11 = vector.load %arg8[%c0_11, %c0_12, %c0_13] : memref<2x2x32xf32, #tpu.memory_space<vmem>>, vector<1x2x32xf32>
    %12 = vector.shape_cast %11 : vector<1x2x32xf32> to vector<2x32xf32>
    %c1_14 = arith.constant 1 : index
    %c0_15 = arith.constant 0 : index
    %c0_16 = arith.constant 0 : index
    %13 = vector.load %arg8[%c1_14, %c0_15, %c0_16] : memref<2x2x32xf32, #tpu.memory_space<vmem>>, vector<1x2x32xf32>
    %14 = vector.shape_cast %13 : vector<1x2x32xf32> to vector<2x32xf32>
    %c0_i32_17 = arith.constant 0 : i32
    %c8_i32 = arith.constant 8 : i32
    %15 = arith.addi %c0_i32_17, %c8_i32 : i32
    %c1_i32 = arith.constant 1 : i32
    %16:2 = scf.for %arg9 = %c0_i32_17 to %15 step %c1_i32 iter_args(%arg10 = %12, %arg11 = %14) -> (vector<2x32xf32>, vector<2x32xf32>)  : i32 {
      %28 = arith.index_cast %arg9 : i32 to index
      %c0_34 = arith.constant 0 : index
      %c0_35 = arith.constant 0 : index
      %29 = vector.load %arg6[%28, %c0_34, %c0_35] : memref<8x2x32xf32, #tpu.memory_space<vmem>>, vector<1x2x32xf32>
      %30 = vector.shape_cast %29 : vector<1x2x32xf32> to vector<2x32xf32>
      %31 = arith.truncf %arg10 : vector<2x32xf32> to vector<2x32xbf16>
      %cst = arith.constant dense<0.000000e+00> : vector<2x32xf32>
      %32 = tpu.matmul %31, %8, %cst {dimension_numbers = #tpu.dot_dimension_numbers<[1], [0], [0], [1], [0, 0, 1, 1], [], []>} : vector<2x32xbf16>, vector<32x32xbf16>, vector<2x32xf32> -> vector<2x32xf32>
      %33 = arith.addf %30, %32 : vector<2x32xf32>
      %34 = arith.truncf %arg11 : vector<2x32xf32> to vector<2x32xbf16>
      %cst_36 = arith.constant dense<0.000000e+00> : vector<2x32xf32>
      %35 = tpu.matmul %34, %10, %cst_36 {dimension_numbers = #tpu.dot_dimension_numbers<[1], [0], [0], [1], [0, 0, 1, 1], [], []>} : vector<2x32xbf16>, vector<32x32xbf16>, vector<2x32xf32> -> vector<2x32xf32>
      %36 = arith.addf %33, %35 : vector<2x32xf32>
      %37 = arith.index_cast %arg9 : i32 to index
      %c0_37 = arith.constant 0 : index
      %c0_38 = arith.constant 0 : index
      %38 = vector.load %arg7[%37, %c0_37, %c0_38] : memref<8x2x32xf32, #tpu.memory_space<vmem>>, vector<1x2x32xf32>
      %39 = vector.shape_cast %38 : vector<1x2x32xf32> to vector<2x32xf32>
      %40 = vector.shape_cast %36 : vector<2x32xf32> to vector<1x2x32xf32>
      tpu.vector_store %arg7[%37, %c0_37, %c0_38], %40 {strides = array<i32>} : memref<8x2x32xf32, #tpu.memory_space<vmem>>, vector<1x2x32xf32>,
      scf.yield %36, %arg10 : vector<2x32xf32>, vector<2x32xf32>
    }
    %c8_i32_18 = arith.constant 8 : i32
    %c0_19 = arith.constant 0 : index
    %c0_20 = arith.constant 0 : index
    %c0_21 = arith.constant 0 : index
    %17 = vector.load %arg8[%c0_19, %c0_20, %c0_21] : memref<2x2x32xf32, #tpu.memory_space<vmem>>, vector<1x2x32xf32>
    %18 = vector.shape_cast %17 : vector<1x2x32xf32> to vector<2x32xf32>
    %19 = vector.shape_cast %16#0 : vector<2x32xf32> to vector<1x2x32xf32>
    tpu.vector_store %arg8[%c0_19, %c0_20, %c0_21], %19 {strides = array<i32>} : memref<2x2x32xf32, #tpu.memory_space<vmem>>, vector<1x2x32xf32>,
    %c1_22 = arith.constant 1 : index
    %c0_23 = arith.constant 0 : index
    %c0_24 = arith.constant 0 : index
    %20 = vector.load %arg8[%c1_22, %c0_23, %c0_24] : memref<2x2x32xf32, #tpu.memory_space<vmem>>, vector<1x2x32xf32>
    %21 = vector.shape_cast %20 : vector<1x2x32xf32> to vector<2x32xf32>
    %22 = vector.shape_cast %16#1 : vector<2x32xf32> to vector<1x2x32xf32>
    tpu.vector_store %arg8[%c1_22, %c0_23, %c0_24], %22 {strides = array<i32>} : memref<2x2x32xf32, #tpu.memory_space<vmem>>, vector<1x2x32xf32>,
    %c0_25 = arith.constant 0 : index
    %c0_26 = arith.constant 0 : index
    %c0_27 = arith.constant 0 : index
    %23 = vector.load %arg7[%c0_25, %c0_26, %c0_27] : memref<8x2x32xf32, #tpu.memory_space<vmem>>, vector<8x2x32xf32>
    %24 = tpu.transpose %23, [1, 0, 2] : vector<8x2x32xf32> -> vector<2x8x32xf32>
    %c0_28 = arith.constant 0 : index
    %c0_29 = arith.constant 0 : index
    %c0_30 = arith.constant 0 : index
    %25 = vector.load %arg3[%c0_28, %c0_29, %c0_30] : memref<2x8x32xf32, #tpu.memory_space<vmem>>, vector<2x8x32xf32>
    %26 = arith.addf %24, %25 : vector<2x8x32xf32>
    %c0_31 = arith.constant 0 : index
    %c0_32 = arith.constant 0 : index
    %c0_33 = arith.constant 0 : index
    %27 = vector.load %arg5[%c0_31, %c0_32, %c0_33] : memref<2x8x32xf32, #tpu.memory_space<vmem>>, vector<2x8x32xf32>
    tpu.vector_store %arg5[%c0_31, %c0_32, %c0_33], %26 {strides = array<i32>} : memref<2x8x32xf32, #tpu.memory_space<vmem>>, vector<2x8x32xf32>,
    return
  }
  func.func @transform_0(%arg0: i32, %arg1: i32) -> (i32, i32, i32) {
    %c0_i32 = arith.constant 0 : i32
    %c0_i32_0 = arith.constant 0 : i32
    return %arg0, %arg1, %c0_i32 : i32, i32, i32
  }
  func.func @transform_1(%arg0: i32, %arg1: i32) -> (i32, i32, i32) {
    %c0_i32 = arith.constant 0 : i32
    %c0_i32_0 = arith.constant 0 : i32
    return %arg0, %arg1, %c0_i32 : i32, i32, i32
  }
  func.func @transform_2(%arg0: i32, %arg1: i32) -> (i32, i32, i32) {
    %c0_i32 = arith.constant 0 : i32
    %c0_i32_0 = arith.constant 0 : i32
    %c0_i32_1 = arith.constant 0 : i32
    %c0_i32_2 = arith.constant 0 : i32
    return %c0_i32, %c0_i32_0, %c0_i32_1 : i32, i32, i32
  }
  func.func @transform_3(%arg0: i32, %arg1: i32) -> (i32, i32, i32) {
    %c0_i32 = arith.constant 0 : i32
    %c0_i32_0 = arith.constant 0 : i32
    return %arg0, %arg1, %c0_i32 : i32, i32, i32
  }
}

module attributes {stable_mosaic.version = 11 : i64} {
  func.func @_ln_delta_kernel(%arg0: i32, %arg1: i32, %arg2: i32, %arg3: memref<1x8x32xf32, #tpu.memory_space<vmem>>, %arg4: memref<1x8x32xf32, #tpu.memory_space<vmem>>, %arg5: memref<1x32xf32, #tpu.memory_space<vmem>>, %arg6: memref<1x32xf32, #tpu.memory_space<vmem>>, %arg7: memref<1x32xf32, #tpu.memory_space<vmem>>, %arg8: memref<7x8x8xbf16, #tpu.memory_space<vmem>>, %arg9: memref<224x32xbf16, #tpu.memory_space<vmem>>, %arg10: memref<1x8x32xf32, #tpu.memory_space<vmem>>, %arg11: memref<1x8x32xbf16, #tpu.memory_space<vmem>>, %arg12: memref<8x32xf32, #tpu.memory_space<vmem>>, %arg13: memref<8x224xbf16, #tpu.memory_space<vmem>>) attributes {dimension_semantics = [#tpu.dimension_semantics<parallel>, #tpu.dimension_semantics<parallel>, #tpu.dimension_semantics<arbitrary>], iteration_bounds = array<i64: 2, 1, 1>, scalar_prefetch = 0 : i64, scratch_operands = 2 : i64, tpu.core_type = #tpu.core_type<tc>, window_params = [{transform_indices = @transform_0, window_bounds = array<i64: 1, 8, 32>}, {transform_indices = @transform_1, window_bounds = array<i64: 1, 8, 32>}, {pipeline_mode = #tpu.pipeline_mode<synchronous>, transform_indices = @transform_2, window_bounds = array<i64: 1, 32>}, {pipeline_mode = #tpu.pipeline_mode<synchronous>, transform_indices = @transform_3, window_bounds = array<i64: 1, 32>}, {pipeline_mode = #tpu.pipeline_mode<synchronous>, transform_indices = @transform_4, window_bounds = array<i64: 1, 32>}, {transform_indices = @transform_5, window_bounds = array<i64: 7, 8, 8>}, {pipeline_mode = #tpu.pipeline_mode<synchronous>, transform_indices = @transform_6, window_bounds = array<i64: 224, 32>}, {transform_indices = @transform_7, window_bounds = array<i64: 1, 8, 32>}, {transform_indices = @transform_8, window_bounds = array<i64: 1, 8, 32>}]} {
    %c0_i32 = arith.constant 0 : i32
    %0 = arith.cmpi eq, %arg2, %c0_i32 : i32
    %1 = arith.extui %0 : i1 to i32
    %c0_i32_0 = arith.constant 0 : i32
    %2 = arith.cmpi ne, %1, %c0_i32_0 : i32
    scf.if %2 {
      %cst_57 = arith.constant 0.000000e+00 : f32
      %88 = vector.broadcast %cst_57 : f32 to vector<8x32xf32>
      %c0_58 = arith.constant 0 : index
      %c0_59 = arith.constant 0 : index
      %89 = vector.load %arg12[%c0_58, %c0_59] : memref<8x32xf32, #tpu.memory_space<vmem>>, vector<8x32xf32>
      tpu.vector_store %arg12[%c0_58, %c0_59], %88 {strides = array<i32>} : memref<8x32xf32, #tpu.memory_space<vmem>>, vector<8x32xf32>,
      %c0_60 = arith.constant 0 : index
      %c0_61 = arith.constant 0 : index
      %c0_62 = arith.constant 0 : index
      %90 = vector.load %arg3[%c0_60, %c0_61, %c0_62] : memref<1x8x32xf32, #tpu.memory_space<vmem>>, vector<1x8x32xf32>
      %91 = vector.shape_cast %90 : vector<1x8x32xf32> to vector<8x32xf32>
      %c0_63 = arith.constant 0 : index
      %c0_64 = arith.constant 0 : index
      %92 = vector.load %arg5[%c0_63, %c0_64] : memref<1x32xf32, #tpu.memory_space<vmem>>, vector<1x32xf32>
      %cst_65 = arith.constant dense<0.000000e+00> : vector<8xf32>
      %93 = vector.multi_reduction <add>, %91, %cst_65 [1] : vector<8x32xf32> to vector<8xf32>
      %94 = vector.shape_cast %93 : vector<8xf32> to vector<8x1xf32>
      %cst_66 = arith.constant 3.200000e+01 : f32
      %95 = vector.broadcast %cst_66 : f32 to vector<8x1xf32>
      %96 = arith.divf %94, %95 : vector<8x1xf32>
      %97 = vector.broadcast %96 : vector<8x1xf32> to vector<8x32xf32>
      %98 = arith.subf %91, %97 : vector<8x32xf32>
      %99 = arith.mulf %98, %98 : vector<8x32xf32>
      %cst_67 = arith.constant dense<0.000000e+00> : vector<8xf32>
      %100 = vector.multi_reduction <add>, %99, %cst_67 [1] : vector<8x32xf32> to vector<8xf32>
      %101 = vector.shape_cast %100 : vector<8xf32> to vector<8x1xf32>
      %cst_68 = arith.constant 3.200000e+01 : f32
      %102 = vector.broadcast %cst_68 : f32 to vector<8x1xf32>
      %103 = arith.divf %101, %102 : vector<8x1xf32>
      %cst_69 = arith.constant 9.99999974E-6 : f32
      %104 = vector.broadcast %cst_69 : f32 to vector<8x1xf32>
      %105 = arith.addf %103, %104 : vector<8x1xf32>
      %106 = math.rsqrt %105 : vector<8x1xf32>
      %107 = vector.broadcast %106 : vector<8x1xf32> to vector<8x32xf32>
      %108 = arith.mulf %98, %107 : vector<8x32xf32>
      %109 = vector.broadcast %92 : vector<1x32xf32> to vector<8x32xf32>
      %110 = arith.mulf %108, %109 : vector<8x32xf32>
      %111 = arith.addf %91, %110 : vector<8x32xf32>
      %c0_70 = arith.constant 0 : index
      %c0_71 = arith.constant 0 : index
      %c0_72 = arith.constant 0 : index
      %112 = vector.load %arg10[%c0_70, %c0_71, %c0_72] : memref<1x8x32xf32, #tpu.memory_space<vmem>>, vector<1x8x32xf32>
      %113 = vector.shape_cast %112 : vector<1x8x32xf32> to vector<8x32xf32>
      %114 = vector.shape_cast %111 : vector<8x32xf32> to vector<1x8x32xf32>
      tpu.vector_store %arg10[%c0_70, %c0_71, %c0_72], %114 {strides = array<i32>} : memref<1x8x32xf32, #tpu.memory_space<vmem>>, vector<1x8x32xf32>,
    } else {
    }
    %c0 = arith.constant 0 : index
    %c0_1 = arith.constant 0 : index
    %c0_2 = arith.constant 0 : index
    %3 = vector.load %arg4[%c0, %c0_1, %c0_2] : memref<1x8x32xf32, #tpu.memory_space<vmem>>, vector<1x8x32xf32>
    %4 = vector.shape_cast %3 : vector<1x8x32xf32> to vector<8x32xf32>
    %c0_3 = arith.constant 0 : index
    %c0_4 = arith.constant 0 : index
    %5 = vector.load %arg5[%c0_3, %c0_4] : memref<1x32xf32, #tpu.memory_space<vmem>>, vector<1x32xf32>
    %cst = arith.constant dense<0.000000e+00> : vector<8xf32>
    %6 = vector.multi_reduction <add>, %4, %cst [1] : vector<8x32xf32> to vector<8xf32>
    %7 = vector.shape_cast %6 : vector<8xf32> to vector<8x1xf32>
    %cst_5 = arith.constant 3.200000e+01 : f32
    %8 = vector.broadcast %cst_5 : f32 to vector<8x1xf32>
    %9 = arith.divf %7, %8 : vector<8x1xf32>
    %10 = vector.broadcast %9 : vector<8x1xf32> to vector<8x32xf32>
    %11 = arith.subf %4, %10 : vector<8x32xf32>
    %12 = arith.mulf %11, %11 : vector<8x32xf32>
    %cst_6 = arith.constant dense<0.000000e+00> : vector<8xf32>
    %13 = vector.multi_reduction <add>, %12, %cst_6 [1] : vector<8x32xf32> to vector<8xf32>
    %14 = vector.shape_cast %13 : vector<8xf32> to vector<8x1xf32>
    %cst_7 = arith.constant 3.200000e+01 : f32
    %15 = vector.broadcast %cst_7 : f32 to vector<8x1xf32>
    %16 = arith.divf %14, %15 : vector<8x1xf32>
    %cst_8 = arith.constant 9.99999974E-6 : f32
    %17 = vector.broadcast %cst_8 : f32 to vector<8x1xf32>
    %18 = arith.addf %16, %17 : vector<8x1xf32>
    %19 = math.rsqrt %18 : vector<8x1xf32>
    %20 = vector.broadcast %19 : vector<8x1xf32> to vector<8x32xf32>
    %21 = arith.mulf %11, %20 : vector<8x32xf32>
    %22 = vector.broadcast %5 : vector<1x32xf32> to vector<8x32xf32>
    %23 = arith.mulf %21, %22 : vector<8x32xf32>
    %c0_9 = arith.constant 0 : index
    %c0_10 = arith.constant 0 : index
    %24 = vector.load %arg6[%c0_9, %c0_10] : memref<1x32xf32, #tpu.memory_space<vmem>>, vector<1x32xf32>
    %cst_11 = arith.constant dense<0.000000e+00> : vector<8xf32>
    %25 = vector.multi_reduction <add>, %23, %cst_11 [1] : vector<8x32xf32> to vector<8xf32>
    %26 = vector.shape_cast %25 : vector<8xf32> to vector<8x1xf32>
    %cst_12 = arith.constant 3.200000e+01 : f32
    %27 = vector.broadcast %cst_12 : f32 to vector<8x1xf32>
    %28 = arith.divf %26, %27 : vector<8x1xf32>
    %29 = vector.broadcast %28 : vector<8x1xf32> to vector<8x32xf32>
    %30 = arith.subf %23, %29 : vector<8x32xf32>
    %31 = arith.mulf %30, %30 : vector<8x32xf32>
    %cst_13 = arith.constant dense<0.000000e+00> : vector<8xf32>
    %32 = vector.multi_reduction <add>, %31, %cst_13 [1] : vector<8x32xf32> to vector<8xf32>
    %33 = vector.shape_cast %32 : vector<8xf32> to vector<8x1xf32>
    %cst_14 = arith.constant 3.200000e+01 : f32
    %34 = vector.broadcast %cst_14 : f32 to vector<8x1xf32>
    %35 = arith.divf %33, %34 : vector<8x1xf32>
    %cst_15 = arith.constant 9.99999974E-6 : f32
    %36 = vector.broadcast %cst_15 : f32 to vector<8x1xf32>
    %37 = arith.addf %35, %36 : vector<8x1xf32>
    %38 = math.rsqrt %37 : vector<8x1xf32>
    %39 = vector.broadcast %38 : vector<8x1xf32> to vector<8x32xf32>
    %40 = arith.mulf %30, %39 : vector<8x32xf32>
    %41 = vector.broadcast %24 : vector<1x32xf32> to vector<8x32xf32>
    %42 = arith.mulf %40, %41 : vector<8x32xf32>
    %43 = arith.truncf %42 : vector<8x32xf32> to vector<8x32xbf16>
    %c0_16 = arith.constant 0 : index
    %c0_17 = arith.constant 0 : index
    %c0_18 = arith.constant 0 : index
    %44 = vector.load %arg8[%c0_16, %c0_17, %c0_18] : memref<7x8x8xbf16, #tpu.memory_space<vmem>>, vector<1x8x8xbf16>
    %45 = vector.shape_cast %44 : vector<1x8x8xbf16> to vector<8x8xbf16>
    %cst_19 = arith.constant dense<0.000000e+00> : vector<8x32xf32>
    %46 = tpu.matmul %45, %43, %cst_19 {dimension_numbers = #tpu.dot_dimension_numbers<[1], [0], [0], [1], [0, 0, 1, 1], [], []>} : vector<8x8xbf16>, vector<8x32xbf16>, vector<8x32xf32> -> vector<8x32xf32>
    %47 = arith.truncf %46 : vector<8x32xf32> to vector<8x32xbf16>
    %c0_20 = arith.constant 0 : index
    %c0_21 = arith.constant 0 : index
    %48 = vector.load %arg13[%c0_20, %c0_21] : memref<8x224xbf16, #tpu.memory_space<vmem>>, vector<8x32xbf16>
    tpu.vector_store %arg13[%c0_20, %c0_21], %47 {strides = array<i32>} : memref<8x224xbf16, #tpu.memory_space<vmem>>, vector<8x32xbf16>,
    %c1 = arith.constant 1 : index
    %c0_22 = arith.constant 0 : index
    %c0_23 = arith.constant 0 : index
    %49 = vector.load %arg8[%c1, %c0_22, %c0_23] : memref<7x8x8xbf16, #tpu.memory_space<vmem>>, vector<1x8x8xbf16>
    %50 = vector.shape_cast %49 : vector<1x8x8xbf16> to vector<8x8xbf16>
    %cst_24 = arith.constant dense<0.000000e+00> : vector<8x32xf32>
    %51 = tpu.matmul %50, %43, %cst_24 {dimension_numbers = #tpu.dot_dimension_numbers<[1], [0], [0], [1], [0, 0, 1, 1], [], []>} : vector<8x8xbf16>, vector<8x32xbf16>, vector<8x32xf32> -> vector<8x32xf32>
    %52 = arith.truncf %51 : vector<8x32xf32> to vector<8x32xbf16>
    %c0_25 = arith.constant 0 : index
    %c32 = arith.constant 32 : index
    %53 = vector.load %arg13[%c0_25, %c32] : memref<8x224xbf16, #tpu.memory_space<vmem>>, vector<8x32xbf16>
    tpu.vector_store %arg13[%c0_25, %c32], %52 {strides = array<i32>} : memref<8x224xbf16, #tpu.memory_space<vmem>>, vector<8x32xbf16>,
    %c2 = arith.constant 2 : index
    %c0_26 = arith.constant 0 : index
    %c0_27 = arith.constant 0 : index
    %54 = vector.load %arg8[%c2, %c0_26, %c0_27] : memref<7x8x8xbf16, #tpu.memory_space<vmem>>, vector<1x8x8xbf16>
    %55 = vector.shape_cast %54 : vector<1x8x8xbf16> to vector<8x8xbf16>
    %cst_28 = arith.constant dense<0.000000e+00> : vector<8x32xf32>
    %56 = tpu.matmul %55, %43, %cst_28 {dimension_numbers = #tpu.dot_dimension_numbers<[1], [0], [0], [1], [0, 0, 1, 1], [], []>} : vector<8x8xbf16>, vector<8x32xbf16>, vector<8x32xf32> -> vector<8x32xf32>
    %57 = arith.truncf %56 : vector<8x32xf32> to vector<8x32xbf16>
    %c0_29 = arith.constant 0 : index
    %c64 = arith.constant 64 : index
    %58 = vector.load %arg13[%c0_29, %c64] : memref<8x224xbf16, #tpu.memory_space<vmem>>, vector<8x32xbf16>
    tpu.vector_store %arg13[%c0_29, %c64], %57 {strides = array<i32>} : memref<8x224xbf16, #tpu.memory_space<vmem>>, vector<8x32xbf16>,
    %c3 = arith.constant 3 : index
    %c0_30 = arith.constant 0 : index
    %c0_31 = arith.constant 0 : index
    %59 = vector.load %arg8[%c3, %c0_30, %c0_31] : memref<7x8x8xbf16, #tpu.memory_space<vmem>>, vector<1x8x8xbf16>
    %60 = vector.shape_cast %59 : vector<1x8x8xbf16> to vector<8x8xbf16>
    %cst_32 = arith.constant dense<0.000000e+00> : vector<8x32xf32>
    %61 = tpu.matmul %60, %43, %cst_32 {dimension_numbers = #tpu.dot_dimension_numbers<[1], [0], [0], [1], [0, 0, 1, 1], [], []>} : vector<8x8xbf16>, vector<8x32xbf16>, vector<8x32xf32> -> vector<8x32xf32>
    %62 = arith.truncf %61 : vector<8x32xf32> to vector<8x32xbf16>
    %c0_33 = arith.constant 0 : index
    %c96 = arith.constant 96 : index
    %63 = vector.load %arg13[%c0_33, %c96] : memref<8x224xbf16, #tpu.memory_space<vmem>>, vector<8x32xbf16>
    tpu.vector_store %arg13[%c0_33, %c96], %62 {strides = array<i32>} : memref<8x224xbf16, #tpu.memory_space<vmem>>, vector<8x32xbf16>,
    %c4 = arith.constant 4 : index
    %c0_34 = arith.constant 0 : index
    %c0_35 = arith.constant 0 : index
    %64 = vector.load %arg8[%c4, %c0_34, %c0_35] : memref<7x8x8xbf16, #tpu.memory_space<vmem>>, vector<1x8x8xbf16>
    %65 = vector.shape_cast %64 : vector<1x8x8xbf16> to vector<8x8xbf16>
    %cst_36 = arith.constant dense<0.000000e+00> : vector<8x32xf32>
    %66 = tpu.matmul %65, %43, %cst_36 {dimension_numbers = #tpu.dot_dimension_numbers<[1], [0], [0], [1], [0, 0, 1, 1], [], []>} : vector<8x8xbf16>, vector<8x32xbf16>, vector<8x32xf32> -> vector<8x32xf32>
    %67 = arith.truncf %66 : vector<8x32xf32> to vector<8x32xbf16>
    %c0_37 = arith.constant 0 : index
    %c128 = arith.constant 128 : index
    %68 = vector.load %arg13[%c0_37, %c128] : memref<8x224xbf16, #tpu.memory_space<vmem>>, vector<8x32xbf16>
    tpu.vector_store %arg13[%c0_37, %c128], %67 {strides = array<i32>} : memref<8x224xbf16, #tpu.memory_space<vmem>>, vector<8x32xbf16>,
    %c5 = arith.constant 5 : index
    %c0_38 = arith.constant 0 : index
    %c0_39 = arith.constant 0 : index
    %69 = vector.load %arg8[%c5, %c0_38, %c0_39] : memref<7x8x8xbf16, #tpu.memory_space<vmem>>, vector<1x8x8xbf16>
    %70 = vector.shape_cast %69 : vector<1x8x8xbf16> to vector<8x8xbf16>
    %cst_40 = arith.constant dense<0.000000e+00> : vector<8x32xf32>
    %71 = tpu.matmul %70, %43, %cst_40 {dimension_numbers = #tpu.dot_dimension_numbers<[1], [0], [0], [1], [0, 0, 1, 1], [], []>} : vector<8x8xbf16>, vector<8x32xbf16>, vector<8x32xf32> -> vector<8x32xf32>
    %72 = arith.truncf %71 : vector<8x32xf32> to vector<8x32xbf16>
    %c0_41 = arith.constant 0 : index
    %c160 = arith.constant 160 : index
    %73 = vector.load %arg13[%c0_41, %c160] : memref<8x224xbf16, #tpu.memory_space<vmem>>, vector<8x32xbf16>
    tpu.vector_store %arg13[%c0_41, %c160], %72 {strides = array<i32>} : memref<8x224xbf16, #tpu.memory_space<vmem>>, vector<8x32xbf16>,
    %c6 = arith.constant 6 : index
    %c0_42 = arith.constant 0 : index
    %c0_43 = arith.constant 0 : index
    %74 = vector.load %arg8[%c6, %c0_42, %c0_43] : memref<7x8x8xbf16, #tpu.memory_space<vmem>>, vector<1x8x8xbf16>
    %75 = vector.shape_cast %74 : vector<1x8x8xbf16> to vector<8x8xbf16>
    %cst_44 = arith.constant dense<0.000000e+00> : vector<8x32xf32>
    %76 = tpu.matmul %75, %43, %cst_44 {dimension_numbers = #tpu.dot_dimension_numbers<[1], [0], [0], [1], [0, 0, 1, 1], [], []>} : vector<8x8xbf16>, vector<8x32xbf16>, vector<8x32xf32> -> vector<8x32xf32>
    %77 = arith.truncf %76 : vector<8x32xf32> to vector<8x32xbf16>
    %c0_45 = arith.constant 0 : index
    %c192 = arith.constant 192 : index
    %78 = vector.load %arg13[%c0_45, %c192] : memref<8x224xbf16, #tpu.memory_space<vmem>>, vector<8x32xbf16>
    tpu.vector_store %arg13[%c0_45, %c192], %77 {strides = array<i32>} : memref<8x224xbf16, #tpu.memory_space<vmem>>, vector<8x32xbf16>,
    %c0_46 = arith.constant 0 : index
    %c0_47 = arith.constant 0 : index
    %79 = vector.load %arg12[%c0_46, %c0_47] : memref<8x32xf32, #tpu.memory_space<vmem>>, vector<8x32xf32>
    %c0_48 = arith.constant 0 : index
    %c0_49 = arith.constant 0 : index
    %80 = vector.load %arg13[%c0_48, %c0_49] : memref<8x224xbf16, #tpu.memory_space<vmem>>, vector<8x224xbf16>
    %c0_50 = arith.constant 0 : index
    %c0_51 = arith.constant 0 : index
    %81 = vector.load %arg9[%c0_50, %c0_51] : memref<224x32xbf16, #tpu.memory_space<vmem>>, vector<224x32xbf16>
    %cst_52 = arith.constant dense<0.000000e+00> : vector<8x32xf32>
    %82 = tpu.matmul %80, %81, %cst_52 {dimension_numbers = #tpu.dot_dimension_numbers<[1], [0], [0], [1], [0, 0, 1, 1], [], []>} : vector<8x224xbf16>, vector<224x32xbf16>, vector<8x32xf32> -> vector<8x32xf32>
    %83 = arith.addf %79, %82 : vector<8x32xf32>
    %c0_53 = arith.constant 0 : index
    %c0_54 = arith.constant 0 : index
    %84 = vector.load %arg12[%c0_53, %c0_54] : memref<8x32xf32, #tpu.memory_space<vmem>>, vector<8x32xf32>
    tpu.vector_store %arg12[%c0_53, %c0_54], %83 {strides = array<i32>} : memref<8x32xf32, #tpu.memory_space<vmem>>, vector<8x32xf32>,
    %c0_i32_55 = arith.constant 0 : i32
    %85 = arith.cmpi eq, %arg2, %c0_i32_55 : i32
    %86 = arith.extui %85 : i1 to i32
    %c0_i32_56 = arith.constant 0 : i32
    %87 = arith.cmpi ne, %86, %c0_i32_56 : i32
    scf.if %87 {
      %c0_57 = arith.constant 0 : index
      %c0_58 = arith.constant 0 : index
      %88 = vector.load %arg12[%c0_57, %c0_58] : memref<8x32xf32, #tpu.memory_space<vmem>>, vector<8x32xf32>
      %c0_59 = arith.constant 0 : index
      %c0_60 = arith.constant 0 : index
      %89 = vector.load %arg7[%c0_59, %c0_60] : memref<1x32xf32, #tpu.memory_space<vmem>>, vector<1x32xf32>
      %cst_61 = arith.constant dense<0.000000e+00> : vector<8xf32>
      %90 = vector.multi_reduction <add>, %88, %cst_61 [1] : vector<8x32xf32> to vector<8xf32>
      %91 = vector.shape_cast %90 : vector<8xf32> to vector<8x1xf32>
      %cst_62 = arith.constant 3.200000e+01 : f32
      %92 = vector.broadcast %cst_62 : f32 to vector<8x1xf32>
      %93 = arith.divf %91, %92 : vector<8x1xf32>
      %94 = vector.broadcast %93 : vector<8x1xf32> to vector<8x32xf32>
      %95 = arith.subf %88, %94 : vector<8x32xf32>
      %96 = arith.mulf %95, %95 : vector<8x32xf32>
      %cst_63 = arith.constant dense<0.000000e+00> : vector<8xf32>
      %97 = vector.multi_reduction <add>, %96, %cst_63 [1] : vector<8x32xf32> to vector<8xf32>
      %98 = vector.shape_cast %97 : vector<8xf32> to vector<8x1xf32>
      %cst_64 = arith.constant 3.200000e+01 : f32
      %99 = vector.broadcast %cst_64 : f32 to vector<8x1xf32>
      %100 = arith.divf %98, %99 : vector<8x1xf32>
      %cst_65 = arith.constant 9.99999974E-6 : f32
      %101 = vector.broadcast %cst_65 : f32 to vector<8x1xf32>
      %102 = arith.addf %100, %101 : vector<8x1xf32>
      %103 = math.rsqrt %102 : vector<8x1xf32>
      %104 = vector.broadcast %103 : vector<8x1xf32> to vector<8x32xf32>
      %105 = arith.mulf %95, %104 : vector<8x32xf32>
      %106 = vector.broadcast %89 : vector<1x32xf32> to vector<8x32xf32>
      %107 = arith.mulf %105, %106 : vector<8x32xf32>
      %108 = arith.truncf %107 : vector<8x32xf32> to vector<8x32xbf16>
      %c0_66 = arith.constant 0 : index
      %c0_67 = arith.constant 0 : index
      %c0_68 = arith.constant 0 : index
      %109 = vector.load %arg11[%c0_66, %c0_67, %c0_68] : memref<1x8x32xbf16, #tpu.memory_space<vmem>>, vector<1x8x32xbf16>
      %110 = vector.shape_cast %109 : vector<1x8x32xbf16> to vector<8x32xbf16>
      %111 = vector.shape_cast %108 : vector<8x32xbf16> to vector<1x8x32xbf16>
      tpu.vector_store %arg11[%c0_66, %c0_67, %c0_68], %111 {strides = array<i32>} : memref<1x8x32xbf16, #tpu.memory_space<vmem>>, vector<1x8x32xbf16>,
    } else {
    }
    return
  }
  func.func @transform_0(%arg0: i32, %arg1: i32, %arg2: i32) -> (i32, i32, i32) {
    %c0_i32 = arith.constant 0 : i32
    %c0_i32_0 = arith.constant 0 : i32
    return %arg0, %arg1, %c0_i32 : i32, i32, i32
  }
  func.func @transform_1(%arg0: i32, %arg1: i32, %arg2: i32) -> (i32, i32, i32) {
    %c0_i32 = arith.constant 0 : i32
    %c0_i32_0 = arith.constant 0 : i32
    return %arg0, %arg2, %c0_i32 : i32, i32, i32
  }
  func.func @transform_2(%arg0: i32, %arg1: i32, %arg2: i32) -> (i32, i32) {
    %c0_i32 = arith.constant 0 : i32
    %c0_i32_0 = arith.constant 0 : i32
    %c0_i32_1 = arith.constant 0 : i32
    return %c0_i32, %c0_i32_0 : i32, i32
  }
  func.func @transform_3(%arg0: i32, %arg1: i32, %arg2: i32) -> (i32, i32) {
    %c0_i32 = arith.constant 0 : i32
    %c0_i32_0 = arith.constant 0 : i32
    %c0_i32_1 = arith.constant 0 : i32
    return %c0_i32, %c0_i32_0 : i32, i32
  }
  func.func @transform_4(%arg0: i32, %arg1: i32, %arg2: i32) -> (i32, i32) {
    %c0_i32 = arith.constant 0 : i32
    %c0_i32_0 = arith.constant 0 : i32
    %c0_i32_1 = arith.constant 0 : i32
    return %c0_i32, %c0_i32_0 : i32, i32
  }
  func.func @transform_5(%arg0: i32, %arg1: i32, %arg2: i32) -> (i32, i32, i32) {
    %c0_i32 = arith.constant 0 : i32
    %c0_i32_0 = arith.constant 0 : i32
    return %c0_i32, %arg1, %arg2 : i32, i32, i32
  }
  func.func @transform_6(%arg0: i32, %arg1: i32, %arg2: i32) -> (i32, i32) {
    %c0_i32 = arith.constant 0 : i32
    %c0_i32_0 = arith.constant 0 : i32
    %c0_i32_1 = arith.constant 0 : i32
    return %c0_i32, %c0_i32_0 : i32, i32
  }
  func.func @transform_7(%arg0: i32, %arg1: i32, %arg2: i32) -> (i32, i32, i32) {
    %c0_i32 = arith.constant 0 : i32
    %c0_i32_0 = arith.constant 0 : i32
    return %arg0, %arg1, %c0_i32 : i32, i32, i32
  }
  func.func @transform_8(%arg0: i32, %arg1: i32, %arg2: i32) -> (i32, i32, i32) {
    %c0_i32 = arith.constant 0 : i32
    %c0_i32_0 = arith.constant 0 : i32
    return %arg0, %arg1, %c0_i32 : i32, i32, i32
  }
}

module attributes {stable_mosaic.version = 11 : i64} {
  func.func @_ln_swiglu_res_kernel(%arg0: i32, %arg1: i32, %arg2: memref<8x32xf32, #tpu.memory_space<vmem>>, %arg3: memref<1x32xf32, #tpu.memory_space<vmem>>, %arg4: memref<32x64xbf16, #tpu.memory_space<vmem>>, %arg5: memref<32x64xbf16, #tpu.memory_space<vmem>>, %arg6: memref<64x32xbf16, #tpu.memory_space<vmem>>, %arg7: memref<8x32xf32, #tpu.memory_space<vmem>>, %arg8: memref<8x32xf32, #tpu.memory_space<vmem>>) attributes {dimension_semantics = [#tpu.dimension_semantics<parallel>, #tpu.dimension_semantics<arbitrary>], iteration_bounds = array<i64: 2, 1>, scalar_prefetch = 0 : i64, scratch_operands = 1 : i64, tpu.core_type = #tpu.core_type<tc>, window_params = [{transform_indices = @transform_0, window_bounds = array<i64: 8, 32>}, {pipeline_mode = #tpu.pipeline_mode<synchronous>, transform_indices = @transform_1, window_bounds = array<i64: 1, 32>}, {transform_indices = @transform_2, window_bounds = array<i64: 32, 64>}, {transform_indices = @transform_3, window_bounds = array<i64: 32, 64>}, {transform_indices = @transform_4, window_bounds = array<i64: 64, 32>}, {transform_indices = @transform_5, window_bounds = array<i64: 8, 32>}]} {
    %c0 = arith.constant 0 : index
    %c0_0 = arith.constant 0 : index
    %0 = vector.load %arg2[%c0, %c0_0] : memref<8x32xf32, #tpu.memory_space<vmem>>, vector<8x32xf32>
    %c0_i32 = arith.constant 0 : i32
    %1 = arith.cmpi eq, %arg1, %c0_i32 : i32
    %2 = arith.extui %1 : i1 to i32
    %c0_i32_1 = arith.constant 0 : i32
    %3 = arith.cmpi ne, %2, %c0_i32_1 : i32
    scf.if %3 {
      %c0_24 = arith.constant 0 : index
      %c0_25 = arith.constant 0 : index
      %44 = vector.load %arg8[%c0_24, %c0_25] : memref<8x32xf32, #tpu.memory_space<vmem>>, vector<8x32xf32>
      tpu.vector_store %arg8[%c0_24, %c0_25], %0 {strides = array<i32>} : memref<8x32xf32, #tpu.memory_space<vmem>>, vector<8x32xf32>,
    } else {
    }
    %c0_2 = arith.constant 0 : index
    %c0_3 = arith.constant 0 : index
    %4 = vector.load %arg3[%c0_2, %c0_3] : memref<1x32xf32, #tpu.memory_space<vmem>>, vector<1x32xf32>
    %cst = arith.constant dense<0.000000e+00> : vector<8xf32>
    %5 = vector.multi_reduction <add>, %0, %cst [1] : vector<8x32xf32> to vector<8xf32>
    %6 = vector.shape_cast %5 : vector<8xf32> to vector<8x1xf32>
    %cst_4 = arith.constant 3.200000e+01 : f32
    %7 = vector.broadcast %cst_4 : f32 to vector<8x1xf32>
    %8 = arith.divf %6, %7 : vector<8x1xf32>
    %9 = vector.broadcast %8 : vector<8x1xf32> to vector<8x32xf32>
    %10 = arith.subf %0, %9 : vector<8x32xf32>
    %11 = arith.mulf %10, %10 : vector<8x32xf32>
    %cst_5 = arith.constant dense<0.000000e+00> : vector<8xf32>
    %12 = vector.multi_reduction <add>, %11, %cst_5 [1] : vector<8x32xf32> to vector<8xf32>
    %13 = vector.shape_cast %12 : vector<8xf32> to vector<8x1xf32>
    %cst_6 = arith.constant 3.200000e+01 : f32
    %14 = vector.broadcast %cst_6 : f32 to vector<8x1xf32>
    %15 = arith.divf %13, %14 : vector<8x1xf32>
    %cst_7 = arith.constant 9.99999974E-6 : f32
    %16 = vector.broadcast %cst_7 : f32 to vector<8x1xf32>
    %17 = arith.addf %15, %16 : vector<8x1xf32>
    %18 = math.rsqrt %17 : vector<8x1xf32>
    %19 = vector.broadcast %18 : vector<8x1xf32> to vector<8x32xf32>
    %20 = arith.mulf %10, %19 : vector<8x32xf32>
    %21 = vector.broadcast %4 : vector<1x32xf32> to vector<8x32xf32>
    %22 = arith.mulf %20, %21 : vector<8x32xf32>
    %23 = arith.truncf %22 : vector<8x32xf32> to vector<8x32xbf16>
    %c0_8 = arith.constant 0 : index
    %c0_9 = arith.constant 0 : index
    %24 = vector.load %arg4[%c0_8, %c0_9] : memref<32x64xbf16, #tpu.memory_space<vmem>>, vector<32x64xbf16>
    %cst_10 = arith.constant dense<0.000000e+00> : vector<8x64xf32>
    %25 = tpu.matmul %23, %24, %cst_10 {dimension_numbers = #tpu.dot_dimension_numbers<[1], [0], [0], [1], [0, 0, 1, 1], [], []>} : vector<8x32xbf16>, vector<32x64xbf16>, vector<8x64xf32> -> vector<8x64xf32>
    %c0_11 = arith.constant 0 : index
    %c0_12 = arith.constant 0 : index
    %26 = vector.load %arg5[%c0_11, %c0_12] : memref<32x64xbf16, #tpu.memory_space<vmem>>, vector<32x64xbf16>
    %cst_13 = arith.constant dense<0.000000e+00> : vector<8x64xf32>
    %27 = tpu.matmul %23, %26, %cst_13 {dimension_numbers = #tpu.dot_dimension_numbers<[1], [0], [0], [1], [0, 0, 1, 1], [], []>} : vector<8x32xbf16>, vector<32x64xbf16>, vector<8x64xf32> -> vector<8x64xf32>
    %28 = arith.negf %25 : vector<8x64xf32>
    %29 = math.exp %28 : vector<8x64xf32>
    %cst_14 = arith.constant 1.000000e+00 : f32
    %30 = vector.broadcast %cst_14 : f32 to vector<8x64xf32>
    %31 = arith.addf %30, %29 : vector<8x64xf32>
    %32 = arith.divf %30, %31 : vector<8x64xf32>
    %33 = arith.mulf %25, %32 : vector<8x64xf32>
    %34 = arith.mulf %33, %27 : vector<8x64xf32>
    %c0_15 = arith.constant 0 : index
    %c0_16 = arith.constant 0 : index
    %35 = vector.load %arg8[%c0_15, %c0_16] : memref<8x32xf32, #tpu.memory_space<vmem>>, vector<8x32xf32>
    %36 = arith.truncf %34 : vector<8x64xf32> to vector<8x64xbf16>
    %c0_17 = arith.constant 0 : index
    %c0_18 = arith.constant 0 : index
    %37 = vector.load %arg6[%c0_17, %c0_18] : memref<64x32xbf16, #tpu.memory_space<vmem>>, vector<64x32xbf16>
    %cst_19 = arith.constant dense<0.000000e+00> : vector<8x32xf32>
    %38 = tpu.matmul %36, %37, %cst_19 {dimension_numbers = #tpu.dot_dimension_numbers<[1], [0], [0], [1], [0, 0, 1, 1], [], []>} : vector<8x64xbf16>, vector<64x32xbf16>, vector<8x32xf32> -> vector<8x32xf32>
    %39 = arith.addf %35, %38 : vector<8x32xf32>
    %c0_20 = arith.constant 0 : index
    %c0_21 = arith.constant 0 : index
    %40 = vector.load %arg8[%c0_20, %c0_21] : memref<8x32xf32, #tpu.memory_space<vmem>>, vector<8x32xf32>
    tpu.vector_store %arg8[%c0_20, %c0_21], %39 {strides = array<i32>} : memref<8x32xf32, #tpu.memory_space<vmem>>, vector<8x32xf32>,
    %c0_i32_22 = arith.constant 0 : i32
    %41 = arith.cmpi eq, %arg1, %c0_i32_22 : i32
    %42 = arith.extui %41 : i1 to i32
    %c0_i32_23 = arith.constant 0 : i32
    %43 = arith.cmpi ne, %42, %c0_i32_23 : i32
    scf.if %43 {
      %c0_24 = arith.constant 0 : index
      %c0_25 = arith.constant 0 : index
      %44 = vector.load %arg8[%c0_24, %c0_25] : memref<8x32xf32, #tpu.memory_space<vmem>>, vector<8x32xf32>
      %c0_26 = arith.constant 0 : index
      %c0_27 = arith.constant 0 : index
      %45 = vector.load %arg7[%c0_26, %c0_27] : memref<8x32xf32, #tpu.memory_space<vmem>>, vector<8x32xf32>
      tpu.vector_store %arg7[%c0_26, %c0_27], %44 {strides = array<i32>} : memref<8x32xf32, #tpu.memory_space<vmem>>, vector<8x32xf32>,
    } else {
    }
    return
  }
  func.func @transform_0(%arg0: i32, %arg1: i32) -> (i32, i32) {
    %c0_i32 = arith.constant 0 : i32
    %c0_i32_0 = arith.constant 0 : i32
    return %arg0, %c0_i32 : i32, i32
  }
  func.func @transform_1(%arg0: i32, %arg1: i32) -> (i32, i32) {
    %c0_i32 = arith.constant 0 : i32
    %c0_i32_0 = arith.constant 0 : i32
    %c0_i32_1 = arith.constant 0 : i32
    return %c0_i32, %c0_i32_0 : i32, i32
  }
  func.func @transform_2(%arg0: i32, %arg1: i32) -> (i32, i32) {
    %c0_i32 = arith.constant 0 : i32
    %c0_i32_0 = arith.constant 0 : i32
    return %c0_i32, %arg1 : i32, i32
  }
  func.func @transform_3(%arg0: i32, %arg1: i32) -> (i32, i32) {
    %c0_i32 = arith.constant 0 : i32
    %c0_i32_0 = arith.constant 0 : i32
    return %c0_i32, %arg1 : i32, i32
  }
  func.func @transform_4(%arg0: i32, %arg1: i32) -> (i32, i32) {
    %c0_i32 = arith.constant 0 : i32
    %c0_i32_0 = arith.constant 0 : i32
    return %arg1, %c0_i32 : i32, i32
  }
  func.func @transform_5(%arg0: i32, %arg1: i32) -> (i32, i32) {
    %c0_i32 = arith.constant 0 : i32
    %c0_i32_0 = arith.constant 0 : i32
    return %arg0, %c0_i32 : i32, i32
  }
}

</mosaic_0001>

<bundles_post_ra>
// kernel: stu_block_forward.4
= control target key start
LH: loop header
LB: loop body
LE: loop exit
PB: predicated region body
PF: predicated region fallthrough
CT: control target
= control target key end

     0   :  { %8 = vsyncpa [#allocation6], 0  ;;  %s726_s0 = inlined_call_operand.hbm [shape: bf16[2,8,32], index: 0, kind: input, shape index: {}]   ;;  %s727_s1 = inlined_call_operand.hbm [shape: f32[2,8,32], index: 1, kind: input, shape index: {}]   ;;  %s728_s2 = inlined_call_operand.hbm [shape: bf16[2,32,32], index: 2, kind: input, shape index: {}]   ;;  %s729_s3 = inlined_call_operand.hbm [shape: f32[2,8,32], index: 3, kind: output, shape index: {}]  }
   0x1   :  { %9 = vsyncpa [#allocation9], 0 }
   0x2   :  { %10 = vsyncpa [#allocation7], 0  ;;  %s581_s12 = smov [#allocation8]   ;;  %s463_s16 = scalar_lea.hbm %s727_s1, 256 }
   0x3   :  { %s28_s13 = sshll.u32 %s581_s12, 4  ;;  %p464_p0 = scmp.ne.s32.totalorder %s727_s1, %s463_s16  ;;  %s29_s13 = int_to_ptr.vmem [resolvable:$true] %s28_s13 }
   0x4   :  { %p467_p1 = scmp.lt.u32.totalorder %s463_s16, %s727_s1 }
   0x6   :  { %p469_p2 = pnand %p467_p1, %p464_p0 }
   0x8   :  { %472 = shalt.err (!%p469_p2)
}
   0x9   :  { %s473_s21 = scalar_lea.vmem %s29_s13, 256  ;;  %p478_p4 = scmp.lt.s32.totalorder %s29_s13, %s29_s13 }
   0xa   :  { %p474_p3 = scmp.ne.s32.totalorder %s29_s13, %s473_s21  ;;  %p479_p5 = scmp.lt.s32.totalorder %s473_s21, %s473_s21 }
   0xc   :  { %p480_p6 = por %p479_p5, %p478_p4 }
   0xe   :  { %p481_p7 = pnand %p480_p6, %p474_p3 }
  0x10   :  { %484 = shalt.err (!%p481_p7)
}
  0x11   :  { %s582_s22 = smov 128   ;;  %s583_s23 = smov 8  }
  0x12   :  { %34 = dma.hbm_to_vmem [thread:$0]  %s727_s1, 256, %s29_s13, [#allocation9], %s582_s22, %s582_s22, %s583_s23  }
  0x13   :  { %s584_s26 = smov [#allocation5]   ;;  %s485_s30 = scalar_lea.hbm %s726_s0, 128 }
  0x14   :  { %s16_s27 = sshll.u32 %s584_s26, 4  ;;  %p486_p8 = scmp.ne.s32.totalorder %s726_s0, %s485_s30  ;;  %s17_s27 = int_to_ptr.vmem [resolvable:$true] %s16_s27 }
  0x15   :  { %p489_p9 = scmp.lt.u32.totalorder %s485_s30, %s726_s0 }
  0x17   :  { %p491_p10 = pnand %p489_p9, %p486_p8 }
  0x19   :  { %494 = shalt.err (!%p491_p10)
}
  0x1a   :  { %s495_s8 = scalar_lea.vmem %s17_s27, 128  ;;  %p500_p12 = scmp.lt.s32.totalorder %s17_s27, %s17_s27 }
  0x1b   :  { %p496_p11 = scmp.ne.s32.totalorder %s17_s27, %s495_s8  ;;  %p501_p13 = scmp.lt.s32.totalorder %s495_s8, %s495_s8 }
  0x1d   :  { %p502_p0 = por %p501_p13, %p500_p12 }
  0x1f   :  { %p503_p1 = pnand %p502_p0, %p496_p11 }
  0x21   :  { %506 = shalt.err (!%p503_p1)
}
  0x22   :  { %s585_s1 = smov 64   ;;  %s586_s9 = smov 4  }
  0x23   :  { %22 = dma.hbm_to_vmem [thread:$0]  %s726_s0, 128, %s17_s27, [#allocation6], %s585_s1, %s585_s1, %s586_s9  }
  0x24   :  { %s587_s12 = smov [#allocation10]   ;;  %s507_s16 = scalar_lea.hbm %s728_s2, 512 }
  0x25   :  { %s40_s13 = sshll.u32 %s587_s12, 4  ;;  %p508_p2 = scmp.ne.s32.totalorder %s728_s2, %s507_s16  ;;  %s41_s13 = int_to_ptr.vmem [resolvable:$true] %s40_s13 }
  0x26   :  { %p511_p3 = scmp.lt.u32.totalorder %s507_s16, %s728_s2 }
  0x28   :  { %p513_p4 = pnand %p511_p3, %p508_p2 }
  0x2a   :  { %516 = shalt.err (!%p513_p4)
}
  0x2b   :  { %s517_s21 = scalar_lea.vmem %s41_s13, 512  ;;  %p522_p6 = scmp.lt.s32.totalorder %s41_s13, %s41_s13 }
  0x2c   :  { %p518_p5 = scmp.ne.s32.totalorder %s41_s13, %s517_s21  ;;  %p523_p7 = scmp.lt.s32.totalorder %s517_s21, %s517_s21 }
  0x2e   :  { %p524_p8 = por %p523_p7, %p522_p6 }
  0x30   :  { %p525_p9 = pnand %p524_p8, %p518_p5 }
  0x32   :  { %528 = shalt.err (!%p525_p9)
}
  0x33   :  { %46 = dma.hbm_to_vmem [thread:$0]  %s728_s2, 512, %s41_s13, [#allocation9], %s585_s1, %s585_s1, %s586_s9  }
  0x34   :  { %563 = dma.done.wait [#allocation6], 128  }
  0x35   :  { %564 = vsyncadd [#allocation6], 4294967168 }
  0x36   :  { %565 = dma.done.wait [#allocation9], 768  }
  0x37   :  { %566 = vsyncadd [#allocation9], 4294966528  ;;  %vm61_vm0 = vcmask 254976   ;;  %v588_v0 = vmov 0.0   ;;  %v589_v1 = vmov 1983009808   ;;  %v72_v3 = vlaneseq }
  0x38   :  { %62 = vst.msk [vmem:[#allocation4] sm:$0x3] %vm61_vm0, %v588_v0  ;;  %63 = vst.msk [vmem:[#allocation4 + $0x2] sm:$0x3] %vm61_vm0, %v588_v0  ;;  %v70_v2 = vunpack.c.l.s4 %v589_v1  ;;  %v590_v4 = vmov 1934713408  }
  0x39   :  { %v101_v5 = vunpack.c.l.s4 %v590_v4  ;;  %v73_v7 = vshrl.u32 %v72_v3, 7  ;;  %v655_v8 = vld [vmem:[#allocation10] sm:$0xf]  ;;  %v657_v9 = vld [vmem:[#allocation10 + $0x4] sm:$0xf]  ;;  %v391_v20 = vld [vmem:[#allocation5] sm:$0xff]  }
  0x3a   :  { %v71_v6 = vunpack.c.0.s8 %v70_v2  ;;  %v659_v10 = vld [vmem:[#allocation10 + $0x8] sm:$0xf]  ;;  %v661_v11 = vld [vmem:[#allocation10 + $0xc] sm:$0xf]  ;;  %v663_v12 = vld [vmem:[#allocation10 + $0x10] sm:$0xf]  ;;  %v392_v21 = vunpack.c.l.bf16 %v391_v20  ;;  %v393_v22 = vunpack.c.h.bf16 %v391_v20 }
  0x3b   :  { %v665_v13 = vld [vmem:[#allocation10 + $0x14] sm:$0xf]  ;;  %v102_v14 = vunpack.c.0.s8 %v101_v5  ;;  %v667_v15 = vld [vmem:[#allocation10 + $0x18] sm:$0xf]  ;;  %v669_v16 = vld [vmem:[#allocation10 + $0x1c] sm:$0xf] }
  0x3c   :  { %v74_v18 = vsub.s32 %v71_v6, %v73_v7  ;;  %v68_v26 = vcombine.high %v392_v21, %v588_v0  ;;  %v83_v27 = vcombine.high %v393_v22, %v588_v0  ;;  %s685_s2 = smov 0  }
  0x3d   :  { %v671_v23 = vsub.s32 %v102_v14, %v73_v7 }
  0x3e   :  { %v75_v24 = vrot.slane %v392_v21, %v74_v18  ;;  %v90_v25 = vrot.slane %v393_v22, %v74_v18  ;;  %v82_v30 = vrot.slane %v68_v26, %v74_v18  ;;  %v97_v31 = vrot.slane %v83_v27, %v74_v18 }
  0x3f   :  { %v152_v17 = vld [vmem:[#allocation4] sm:$0x3]   ;;  %v154_v19 = vld [vmem:[#allocation4 + $0x2] sm:$0x3]  }
  0x40   :  { %v98_v28 = vcombine.low %v75_v24, %v90_v25  ;;  %v99_v29 = vcombine.high %v75_v24, %v90_v25  ;;  %v114_v34 = vcombine.low %v82_v30, %v97_v31  ;;  %v115_v35 = vcombine.high %v82_v30, %v97_v31 }
  0x41   :  { %v569_v42 = vmov %v154_v19   ;;  %v573_v43 = vmov %v152_v17  }
  0x42   :  { %v106_v32 = vrot.slane %v98_v28, %v671_v23  ;;  %v113_v33 = vrot.slane %v99_v29, %v671_v23  ;;  %v122_v38 = vrot.slane %v114_v34, %v671_v23  ;;  %v129_v39 = vrot.slane %v115_v35, %v671_v23 }
  0x44   :  { %135 = vst.msk [vmem:[#allocation2] sm:$0x3] %vm61_vm0, %v106_v32  ;;  %v130_v36 = vcombine.high %v106_v32, %v588_v0  ;;  %137 = vst.msk [vmem:[#allocation2 + $0x4] sm:$0x3] %vm61_vm0, %v113_v33  ;;  %v131_v37 = vcombine.high %v113_v33, %v588_v0  ;;  %v132_v40 = vcombine.high %v122_v38, %v588_v0 }
  0x45   :  { %139 = vst.msk [vmem:[#allocation2 + $0x8] sm:$0x3] %vm61_vm0, %v122_v38  ;;  %141 = vst.msk [vmem:[#allocation2 + $0xc] sm:$0x3] %vm61_vm0, %v129_v39  ;;  %v133_v41 = vcombine.high %v129_v39, %v588_v0 }
  0x46   :  { %136 = vst.msk [vmem:[#allocation2 + $0x2] sm:$0x3] %vm61_vm0, %v130_v36  ;;  %138 = vst.msk [vmem:[#allocation2 + $0x6] sm:$0x3] %vm61_vm0, %v131_v37 }
  0x47   :  { %140 = vst.msk [vmem:[#allocation2 + $0xa] sm:$0x3] %vm61_vm0, %v132_v40  ;;  %142 = vst.msk [vmem:[#allocation2 + $0xe] sm:$0x3] %vm61_vm0, %v133_v41 }
  0x48 LB: > { %v576_v44 = vmov %v575_v43   ;;  %v384_v45 = vcombine.low %v655_v8, %v657_v9  ;;  %v387_v46 = vcombine.low %v663_v12, %v665_v13  ;;  %v591_v47 = vmov 0.0   ;;  %s383_s25 = sshll.u32 %s579_s2, 1  ;;  %s160_s2 = sadd.s32 1, %s579_s2   ;;  %s579_s2 = sphi %s685_s2, %s160_s2   ;;  %v575_v43 = vphi %v573_v43, %v574_v43   ;;  %v571_v42 = vphi %v569_v42, %v570_v42  }
  0x49   : > { %400 = vmatprep.subr.bf16.mxu1 %v591_v47  ;;  %408 = vmatprep.subr.bf16.mxu0 %v591_v47  ;;  %v385_v48 = vcombine.low %v659_v10, %v661_v11  ;;  %v388_v49 = vcombine.low %v667_v15, %v669_v16  ;;  %vm592_vm1 = vmmov 0   ;;  %v166_v50 = vpack.c.bf16 %v576_v44, %v576_v44  ;;  %s164_s26 = scalar_lea.vmem [#allocation2], %s383_s25  ;;  %s281_s27 = scalar_lea.vmem [#allocation3], %s383_s25 }
  0x4a   : > { %401 = vmatpush3.bf16.msra.mxu1 %v384_v45  ;;  %409 = vmatpush3.bf16.msra.mxu0 %v387_v46  ;;  %v224_v51 = vpack.c.bf16 %v571_v42, %v571_v42  ;;  %vm179_vm2 = vcmask 261120   ;;  %p157_p10 = scmp.ge.s32.totalorder %s160_s2, 8   ;;  %v570_v42 = vmov %v576_v44  }
  0x4b   : > { %402 = vmatprep.subr.bf16.mxu1 %v591_v47  ;;  %410 = vmatprep.subr.bf16.mxu0 %v591_v47  ;;  %284 = vst.msk [vmem:[#allocation4 + $0x2] sm:$0x3] (%p157_p10), %vm61_vm0, %v576_v44  ;;  %v343_v7 = vld [vmem:[#allocation8] sm:$0xff] (%p157_p10)  ;;  %v344_v14 = vld [vmem:[#allocation8 + $0x8] sm:$0xff] (%p157_p10)  ;;  %s593_s28 = smov (%p157_p10), [#allocation11]  }
  0x4c   : > { %404 = vmatprep.mubr.msk.bf16.mxu1 %vm592_vm1, %v591_v47  ;;  %412 = vmatprep.mubr.msk.bf16.mxu0 %vm592_vm1, %v591_v47  ;;  %s355_s29 = sshll.u32 (%p157_p10), %s593_s28, 4  ;;  %s356_s29 = int_to_ptr.vmem [resolvable:$true] %s355_s29 }
  0x4d   :  { %s529_s30 = scalar_lea.vmem (%p157_p10), %s356_s29, 256  ;;  %p534_p12 = scmp.lt.s32.totalorder (%p157_p10), %s356_s29, %s356_s29 }
  0x4e   : > { %403 = vmatpush3.bf16.msra.mxu1 %v385_v48  ;;  %411 = vmatpush3.bf16.msra.mxu0 %v388_v49  ;;  %v165_v52 = vld [vmem:[%s164_s26] sm:$0x3]  ;;  %p530_p11 = scmp.ne.s32.totalorder (%p157_p10), %s356_s29, %s529_s30  ;;  %p535_p13 = scmp.lt.s32.totalorder (%p157_p10), %s529_s30, %s529_s30 }
  0x50   :  { %p536_p0 = por (%p157_p10), %p535_p13, %p534_p12 }
  0x51   : > { %405 = vmatmul.mubr.msk.bf16.vlgmr.msra.gmra.mrb[0].mxu1 %vm179_vm2, %v166_v50  ;;  %413 = vmatmul.mubr.msk.bf16.vlgmr.msra.gmra.mrb[0].mxu0 %vm179_vm2, %v224_v51 }
  0x52   :  { %p537_p1 = pnand (%p157_p10), %p536_p0, %p530_p11 }
 0x123   :  { %159 = sbr.rel (!%p157_p10) target bundleno = 72 (0x48), region = 59 }
 0x124   : > { %v217_v53 = vpop.f32.mrb[0].mxu1  ;;  %v274_v54 = vpop.f32.mrb[0].mxu0 }
 0x125   : > { %v223_v55 = vadd.f32 %v217_v53, %v165_v52  ;;  %v406_v56 = vpop.f32.mrb[1].mxu1  ;;  %v414_v57 = vpop.f32.mrb[1].mxu0 }
 0x126   : > { %v220_v58 = vpop.f32.mrb[2].mxu1  ;;  %v277_v59 = vpop.f32.mrb[2].mxu0 }
 0x127   : > { %v280_v60 = vadd.f32 %v274_v54, %v223_v55   ;;  %v407_v61 = vpop.f32.mrb[3].mxu1  ;;  %v415_v62 = vpop.f32.mrb[3].mxu0 }
 0x129   : > { %282 = vst.msk [vmem:[%s281_s27] sm:$0x3] %vm61_vm0, %v280_v60  ;;  %v574_v43 = vmov %v280_v60   ;;  %283 = vst.msk [vmem:[#allocation4] sm:$0x3] (%p157_p10), %vm61_vm0, %v280_v60 }
 0x130   :  { %v459_v63 = vld.sshfl [vmem:[#allocation3] sm:$0xf pattern:$0x76325410] }
 0x131   :  { %v460_v0 = vld.sshfl [vmem:[#allocation3 + $0x2] sm:$0xf pattern:$0x76325410] }
 0x132   :  { %v461_v1 = vld.sshfl [vmem:[#allocation3 + $0x8] sm:$0xf pattern:$0x76325410]  ;;  %v325_v3 = vcombine.low %v459_v63, %v460_v0 }
 0x133   :  { %v462_v2 = vld.sshfl [vmem:[#allocation3 + $0xa] sm:$0xf pattern:$0x76325410] }
 0x134   :  { %v333_v4 = vcombine.low %v461_v1, %v462_v2  ;;  %v332_v5 = vrot.slane %v325_v3, %v671_v23 }
 0x136   :  { %v340_v6 = vrot.slane %v333_v4, %v671_v23 }
 0x138   :  { %v341_v17 = vcombine.low %v332_v5, %v340_v6  ;;  %v342_v18 = vcombine.high %v332_v5, %v340_v6 }
 0x13a   :  { %v345_v8 = vadd.f32 %v343_v7, %v341_v17  ;;  %v346_v9 = vadd.f32 %v344_v14, %v342_v18 }
 0x13c   :  { %348 = vst.msk [vmem:[#allocation11] sm:$0xff] %vm179_vm2, %v345_v8  ;;  %349 = vst.msk [vmem:[#allocation11 + $0x8] sm:$0xff] %vm179_vm2, %v346_v9 }
 0x13d   :  { %540 = shalt.err (!%p537_p1)
}
 0x13e   :  { %s541_s6 = scalar_lea.hbm %s729_s3, 256 }
 0x13f   :  { %p542_p2 = scmp.ne.s32.totalorder %s729_s3, %s541_s6  ;;  %p545_p3 = scmp.lt.u32.totalorder %s541_s6, %s729_s3 }
 0x141   :  { %p547_p4 = pnand %p545_p3, %p542_p2 }
 0x143   :  { %550 = shalt.err (!%p547_p4)
}
 0x144   :  { %361 = dma.vmem_to_hbm [thread:$0]  %s356_s29, 256, %s729_s3, [#allocation7], %s582_s22, %s582_s22, %s583_s23  }
 0x145   :  { %567 = dma.done.wait [#allocation7], 256  }
 0x146   :  { %568 = vsyncadd [#allocation7], 4294967040 }
 0x147   :  { %365 = vsyncpa [#allocation6], 1 }
 0x148   :  { %366 = vsyncpa [#allocation9], 1 }
 0x149   :  { %367 = vsyncpa [#allocation7], 1 }

// kernel: stu_block_forward.5
= control target key start
LH: loop header
LB: loop body
LE: loop exit
PB: predicated region body
PF: predicated region fallthrough
CT: control target
= control target key end

     0   :  { %10 = vsyncpa [#allocation4], 0  ;;  %s1486_s0 = inlined_call_operand.hbm [shape: f32[16,32], index: 0, kind: input, shape index: {}]   ;;  %s1487_s1 = inlined_call_operand.hbm [shape: f32[1,32], index: 1, kind: input, shape index: {}]   ;;  %s1488_s2 = inlined_call_operand.hbm [shape: bf16[32,64], index: 2, kind: input, shape index: {}]   ;;  %s1489_s3 = inlined_call_operand.hbm [shape: bf16[32,64], index: 3, kind: input, shape index: {}]   ;;  %s1490_s4 = inlined_call_operand.hbm [shape: bf16[64,32], index: 4, kind: input, shape index: {}]   ;;  %s1491_s5 = inlined_call_operand.hbm [shape: f32[16,32], index: 5, kind: output, shape index: {}]  }
   0x1   :  { %12 = vsyncpa [#allocation4 + $0x1], 0 }
   0x2   :  { %13 = vsyncpa [#allocation7], 0 }
   0x3   :  { %14 = vsyncpa [#allocation10], 0 }
   0x4   :  { %15 = vsyncpa [#allocation5], 0 }
   0x5   :  { %17 = vsyncpa [#allocation5 + $0x1], 0  ;;  %s1175_s18 = smov 0   ;;  %s1177_s19 = smov 0  }
   0x6   :  { %s1179_s20 = smov 0   ;;  %s1181_s21 = smov 0  }
   0x7   :  { %s1183_s22 = smov 0   ;;  %s1185_s23 = smov 0  }
   0x8 LB: > { %s707_s24 = sadd.s32 4294967295, %s1133_s23   ;;  %p709_p0 = scmp.ge.s32.totalorder %s1133_s23, 1  ;;  %s1133_s23 = sphi %s1185_s23, %s23_s23   ;;  %s1129_s22 = sphi %s1183_s22, %s1515_s22   ;;  %s1125_s21 = sphi %s1181_s21, %s1514_s21   ;;  %s1121_s20 = sphi %s1179_s20, %s1513_s20   ;;  %s1117_s19 = sphi %s1177_s19, %s1512_s19   ;;  %s1113_s18 = sphi %s1175_s18, %s1511_s18  }
   0x9   : > { %p1209_p1 = scmp.eq.s32.totalorder %s707_s24, 0  ;;  %p191_p2 = scmp.lt.s32.totalorder %s1133_s23, 3 }
   0xa   : > { %s1135_s27 = smov [#allocation6]   ;;  %s1136_s30 = smov [#allocation9]  }
   0xb   : > { %s1496_s25 = scalar_select %p1209_p1, 1, 0 }
   0xc   : > { %p1214_p3 = pnand %p709_p0, %p191_p2  ;;  %s204_s28 = sshll.u32 %s1135_s27, 4  ;;  %s205_s28 = int_to_ptr.vmem [resolvable:$true] %s204_s28 }
   0xd   : > { %s231_s6 = sshll.u32 %s1136_s30, 4  ;;  %s1137_s7 = smov [#allocation8]   ;;  %s1227_s6 = int_to_ptr.vmem [resolvable:$true] %s231_s6 }
   0xe   : > { %s1497_s26 = scalar_select %p1214_p3, 1, 0 }
   0xf   : > { %p800_p5 = pneg %p1214_p3  ;;  %s1229_s8 = sshll.u32 %s1137_s7, 4  ;;  %s217_s8 = int_to_ptr.vmem [resolvable:$true] %s1229_s8 }
  0x10   : > { %s901_s11 = scalar_lea.hbm %s1487_s1, 16 }
  0x11   : > { %p1223_p6 = pnand %p800_p5, %p1209_p1  ;;  %p902_p7 = scmp.ne.s32.totalorder %s1487_s1, %s901_s11 }
  0x12   : > { %p908_p11 = scmp.lt.u32.totalorder %s901_s11, %s1487_s1 }
  0x13   : > { %p1239_p8 = pneg %p1223_p6 }
  0x15   : > { %p904_p9 = pnand %p1239_p8, %p902_p7 }
  0x17   : > { %p905_p10 = pneg %p904_p9 }
  0x19   : > { %p910_p12 = pnand %p908_p11, %p905_p10 }
  0x1b   : > { %913 = shalt.err (!%p910_p12)
}
  0x1c   : > { %s914_s17 = scalar_lea.vmem %s205_s28, 16  ;;  %s921_s27 = scalar_lea.vmem %s205_s28, 32 }
  0x1d   : > { %p915_p13 = scmp.ne.s32.totalorder %s205_s28, %s914_s17  ;;  %p922_p5 = scmp.lt.s32.totalorder %s205_s28, %s205_s28 }
  0x1e   : > { %p923_p4 = scmp.lt.s32.totalorder %s921_s27, %s914_s17 }
  0x1f   : > { %p917_p0 = pnand %p915_p13, %p1239_p8 }
  0x20   : > { %p924_p3 = por %p923_p4, %p922_p5 }
  0x21   : > { %p918_p2 = pneg %p917_p0 }
  0x23   : > { %p925_p1 = pnand %p924_p3, %p918_p2 }
  0x25   : > { %928 = shalt.err (!%p925_p1)
}
  0x26   : > { %803 = dma.hbm_to_vmem [thread:$0]  (!%p1223_p6), %s1487_s1, 16, %s205_s28, [#allocation7]  }
  0x27   : > { %s929_s11 = scalar_lea.hbm %s1489_s3, 256 }
  0x28   : > { %p930_p7 = scmp.ne.s32.totalorder %s1489_s3, %s929_s11  ;;  %p936_p1 = scmp.lt.u32.totalorder %s929_s11, %s1489_s3 }
  0x2a   : > { %p932_p9 = pnand %p930_p7, %p1239_p8 }
  0x2c   : > { %p933_p4 = pneg %p932_p9 }
  0x2e   : > { %p938_p3 = pnand %p936_p1, %p933_p4 }
  0x30   : > { %941 = shalt.err (!%p938_p3)
}
  0x31   : > { %s942_s28 = scalar_lea.vmem %s1227_s6, 256  ;;  %p950_p13 = scmp.lt.s32.totalorder %s1227_s6, %s1227_s6 }
  0x32   : > { %p943_p10 = scmp.ne.s32.totalorder %s1227_s6, %s942_s28  ;;  %p951_p0 = scmp.lt.s32.totalorder %s942_s28, %s942_s28 }
  0x34   : > { %p945_p11 = pnand %p943_p10, %p1239_p8  ;;  %p952_p2 = por %p951_p0, %p950_p13 }
  0x36   : > { %p946_p12 = pneg %p945_p11 }
  0x38   : > { %p953_p5 = pnand %p952_p2, %p946_p12 }
  0x3a   : > { %956 = shalt.err (!%p953_p5)
}
  0x3b   : > { %s1138_s17 = smov 64   ;;  %s1139_s27 = smov 4  }
  0x3c   : > { %809 = dma.hbm_to_vmem [thread:$0]  (!%p1223_p6), %s1489_s3, 256, %s1227_s6, [#allocation10], %s1138_s17, %s1138_s17, %s1139_s27  }
  0x3d   : > { %s957_s11 = scalar_lea.hbm %s1488_s2, 256 }
  0x3e   : > { %p958_p7 = scmp.ne.s32.totalorder %s1488_s2, %s957_s11  ;;  %p964_p1 = scmp.lt.u32.totalorder %s957_s11, %s1488_s2 }
  0x40   : > { %p960_p9 = pnand %p958_p7, %p1239_p8 }
  0x42   : > { %p961_p4 = pneg %p960_p9 }
  0x44   : > { %p966_p3 = pnand %p964_p1, %p961_p4 }
  0x46   : > { %969 = shalt.err (!%p966_p3)
}
  0x47   : > { %s970_s28 = scalar_lea.vmem %s217_s8, 256  ;;  %p978_p13 = scmp.lt.s32.totalorder %s217_s8, %s217_s8 }
  0x48   : > { %p971_p10 = scmp.ne.s32.totalorder %s217_s8, %s970_s28  ;;  %p979_p0 = scmp.lt.s32.totalorder %s970_s28, %s970_s28 }
  0x4a   : > { %p973_p11 = pnand %p971_p10, %p1239_p8  ;;  %p980_p2 = por %p979_p0, %p978_p13 }
  0x4c   : > { %p974_p12 = pneg %p973_p11 }
  0x4e   : > { %p981_p5 = pnand %p980_p2, %p974_p12 }
  0x50   : > { %984 = shalt.err (!%p981_p5)
}
  0x51   : > { %806 = dma.hbm_to_vmem [thread:$0]  (!%p1223_p6), %s1488_s2, 256, %s217_s8, [#allocation7], %s1138_s17, %s1138_s17, %s1139_s27  }
  0x52   : > { %s1140_s7 = smov [#allocation11]   ;;  %s985_s12 = scalar_lea.hbm %s1490_s4, 512 }
  0x53   : > { %s247_s9 = sshll.u32 %s1140_s7, 4  ;;  %p986_p7 = scmp.ne.s32.totalorder %s1490_s4, %s985_s12  ;;  %s248_s9 = int_to_ptr.vmem [resolvable:$true] %s247_s9 }
  0x54   : > { %p992_p1 = scmp.lt.u32.totalorder %s985_s12, %s1490_s4 }
  0x55   : > { %p988_p9 = pnand %p986_p7, %p1239_p8 }
  0x57   : > { %p989_p4 = pneg %p988_p9 }
  0x59   : > { %p994_p3 = pnand %p992_p1, %p989_p4 }
  0x5b   : > { %997 = shalt.err (!%p994_p3)
}
  0x5c   : > { %s998_s8 = scalar_lea.vmem %s248_s9, 512  ;;  %p1006_p13 = scmp.lt.s32.totalorder %s248_s9, %s248_s9 }
  0x5d   : > { %p999_p10 = scmp.ne.s32.totalorder %s248_s9, %s998_s8  ;;  %p1007_p0 = scmp.lt.s32.totalorder %s998_s8, %s998_s8 }
  0x5f   : > { %p1001_p11 = pnand %p999_p10, %p1239_p8  ;;  %p1008_p2 = por %p1007_p0, %p1006_p13 }
  0x61   : > { %p1002_p12 = pneg %p1001_p11 }
  0x63   : > { %p1009_p5 = pnand %p1008_p2, %p1002_p12 }
  0x65   : > { %1012 = shalt.err (!%p1009_p5)
}
  0x66   : > { %812 = dma.hbm_to_vmem [thread:$0]  (!%p1223_p6), %s1490_s4, 512, %s248_s9, [#allocation10], %s1138_s17, %s1138_s17, %s1139_s27  }
  0x67   : > { %s708_s29 = sadd.s32 4294967294, %s1133_s23   ;;  %s35_s14 = sadd.s32 1, %s1129_s22 }
  0x68   : > { %p37_p8 = scmp.ge.s32.totalorder %s35_s14, 2  ;;  %s42_s7 = sadd.s32 1, %s1121_s20 }
  0x69   : > { %p49_p7 = scmp.ne.s32.totalorder %s1121_s20, %s1117_s19  ;;  %p50_p9 = scmp.eq.s32.totalorder %s1133_s23, 0 }
  0x6a   : > { %s1517_s14 = smov (%p37_p8, %s35_s14), 0  ;;  %p55_p1 = scmp.ne.s32.totalorder %s1117_s19, %s1113_s18 }
  0x6b   : > { %p1332_p4 = por %p50_p9, %p49_p7  ;;  %s39_s17 = ssub.s32 %s1129_s22, %s1517_s14 }
  0x6c   : > { %p178_p6 = scmp.eq.s32.totalorder %s707_s24, 1  ;;  %p40_p3 = scmp.eq.s32.totalorder %s39_s17, 0 }
  0x6d   : > { %p1501_p10 = scmp.ne.s32.totalorder %s1496_s25, 0  ;;  %p184_p13 = scmp.eq.s32.totalorder %s708_s29, 1 }
  0x6e   : > { %p1348_p12 = por %p178_p6, %p49_p7  ;;  %p825_p2 = scmp.lt.s32.totalorder %s1133_s23, 2 }
  0x6f   : > { %p1344_p11 = por %p1501_p10, %p55_p1  ;;  %p1355_p0 = por %p184_p13, %p55_p1 }
  0x70   : > { %s1503_s9 = scalar_select %p1348_p12, 1, 0 }
  0x71   : > { %s1353_s11 = scalar_select %p40_p3, %s1121_s20, %s42_s7  }
  0x72   : > { %s1504_s12 = scalar_select %p1355_p0, 1, 0 }
  0x73   : > { %s261_s13 = sand.u32 1, %s1121_s20   ;;  %s716_s24 = sshll.u32 %s1129_s22, 7 }
  0x74   : > { %s715_s15 = sshll.u32 %s261_s13, 3  ;;  %s1365_s8 = scalar_lea.hbm %s1486_s0, %s716_s24 }
  0x75   : > { %s265_s6 = scalar_lea.vmem [#allocation3], %s715_s15  ;;  %p1369_p5 = pnand %p825_p2, %p1332_p4 }
  0x76   : > { %s272_s30 = sshll.u32 %s265_s6, 4  ;;  %s262_s7 = scalar_lea.sflag [#allocation4], %s261_s13  ;;  %s1373_s30 = int_to_ptr.vmem [resolvable:$true] %s272_s30 }
  0x77   : > { %s1013_s17 = scalar_lea.hbm %s1365_s8, 128  ;;  %p1015_p7 = pneg %p1369_p5 }
  0x78   : > { %p1014_p8 = scmp.ne.s32.totalorder %s1365_s8, %s1013_s17  ;;  %s1018_s10 = scalar_lea.hbm %s1486_s0, 256 }
  0x79   : > { %p1019_p4 = scmp.lt.u32.totalorder %s1365_s8, %s1486_s0  ;;  %p1020_p6 = scmp.lt.u32.totalorder %s1018_s10, %s1013_s17 }
  0x7a   : > { %p1016_p9 = pnand %p1015_p7, %p1014_p8  ;;  %p1022_p10 = scmp.lt.u32.totalorder %s1013_s17, %s1365_s8 }
  0x7b   : > { %p1021_p3 = por %p1020_p6, %p1019_p4 }
  0x7c   : > { %p1017_p1 = pneg %p1016_p9 }
  0x7d   : > { %p1023_p13 = por %p1022_p10, %p1021_p3 }
  0x7f   : > { %p1024_p2 = pnand %p1023_p13, %p1017_p1 }
  0x81   : > { %1027 = shalt.err (!%p1024_p2)
}
  0x82   : > { %s1028_s13 = scalar_lea.vmem %s1373_s30, 128  ;;  %s1141_s6 = smov [#allocation3]  }
  0x83   : > { %p1029_p8 = scmp.ne.s32.totalorder %s1373_s30, %s1028_s13  ;;  %s1033_s24 = sshll.u32 %s1141_s6, 4  ;;  %s1034_s24 = int_to_ptr.vmem [resolvable:$false] %s1033_s24 }
  0x84   : > { %s1035_s15 = scalar_lea.vmem %s1034_s24, 256  ;;  %p1036_p12 = scmp.lt.s32.totalorder %s1373_s30, %s1034_s24 }
  0x85   : > { %p1031_p9 = pnand %p1029_p8, %p1015_p7  ;;  %p1037_p4 = scmp.lt.s32.totalorder %s1035_s15, %s1028_s13 }
  0x87   : > { %p1032_p0 = pneg %p1031_p9  ;;  %p1038_p6 = por %p1037_p4, %p1036_p12 }
  0x89   : > { %p1039_p3 = pnand %p1038_p6, %p1032_p0 }
  0x8b   : > { %1042 = shalt.err (!%p1039_p3)
}
  0x8c   : > { %816 = dma.hbm_to_vmem [thread:$0]  (!%p1369_p5), %s1365_s8, 128, %s1373_s30, %s262_s7  }
  0x8d   : > { %p1506_p1 = scmp.ne.s32.totalorder %s1497_s26, 0 }
  0x8e   : > { %s1403_s17 = sand.u32 (!%p1506_p1), 1, %s1117_s19  }
  0x8f   : > { %281 = sbr.rel (%p1506_p1) target bundleno = 950 (0x3b6), region = 40  ;;  %s718_s10 = sshll.u32 (!%p1506_p1), %s1403_s17, 3 }
  0x90   : > { %s284_s16 = scalar_lea.sflag (!%p1506_p1), [#allocation4], %s1403_s17  ;;  %s287_s28 = scalar_lea.vmem (!%p1506_p1), [#allocation3], %s718_s10 }
  0x96   : > { %1096 = dma.done.wait (%p1344_p11), %s284_s16, 128  }
  0x97   : > { %1098 = vsyncadd (%p1344_p11), %s284_s16, 4294967168  ;;  %p1507_p12 = scmp.ne.s32.totalorder %s1496_s25, 0 }
  0x99   : > { %1100 = dma.done.wait (%p1507_p12), [#allocation7], 272  }
  0x9a   : > { %1102 = vsyncadd (%p1507_p12), [#allocation7], 4294967024 }
  0x9b   : > { %1104 = dma.done.wait (%p1507_p12), [#allocation10], 768  }
  0x9c   : > { %1106 = vsyncadd (%p1507_p12), [#allocation10], 4294966528  ;;  %vm337_vm0 = vcmask 261120   ;;  %v332_v0 = vld [vmem:[%s287_s28] sm:$0xff]  ;;  %v887_v7 = vld [vmem:[#allocation8] sm:$0xff]   ;;  %v1142_v8 = vmov 0.0  }
  0x9d   : > { %v341_v1 = vsel %vm337_vm0, %v332_v0, 0.0  ;;  %338 = vst.msk [vmem:[#allocation2] sm:$0xff] %vm337_vm0, %v332_v0  ;;  %752 = vmatprep.subr.bf16.mxu1 %v1142_v8  ;;  %vm1143_vm1 = vmmov 0   ;;  %v888_v9 = vld [vmem:[#allocation8 + $0x8] sm:$0xff]   ;;  %768 = vmatprep.subr.bf16.mxu0 %v1142_v8  ;;  %v724_v14 = vld [vmem:[#allocation6] ss:$0 sm:$0xff] }
  0x9e   : > { %342 = vadd.xlane.f32.xlu0 %v341_v1  ;;  %756 = vmatprep.mubr.msk.bf16.mxu1 %vm1143_vm1, %v1142_v8  ;;  %v889_v17 = vld [vmem:[#allocation9] sm:$0xff]   ;;  %v890_v19 = vld [vmem:[#allocation9 + $0x8] sm:$0xff]   ;;  %v891_v20 = vld [vmem:[#allocation11] sm:$0xff]   ;;  %vm520_vm2 = vcmask 523264   ;;  %s738_s25 = sshll.u32 %s1125_s21, 7  ;;  %s329_s26 = scalar_lea.vmem [#allocation12], %s718_s10 }
  0x9f   : > { %753 = vmatpush3.bf16.msra.mxu1 %v887_v7  ;;  %776 = vmatprep.mubr.msk.bf16.mxu0 %vm1143_vm1, %v1142_v8  ;;  %v892_v21 = vld [vmem:[#allocation11 + $0x8] sm:$0xff]   ;;  %v893_v22 = vld [vmem:[#allocation11 + $0x10] sm:$0xff]   ;;  %v894_v23 = vld [vmem:[#allocation11 + $0x18] sm:$0xff]   ;;  %s585_s27 = sshll.u32 %s329_s26, 4  ;;  %s1436_s29 = scalar_lea.hbm %s1491_s5, %s738_s25  ;;  %s1438_s27 = int_to_ptr.vmem [resolvable:$true] %s585_s27 }
  0xa0   : > { %754 = vmatprep.subr.bf16.mxu1 %v1142_v8  ;;  %769 = vmatpush3.bf16.msra.mxu0 %v891_v20  ;;  %s572_s7 = scalar_lea.sflag [#allocation5], %s1403_s17  ;;  %s1043_s13 = scalar_lea.vmem %s1438_s27, 128 }
  0xa1   : > { %770 = vmatprep.subr.bf16.mxu0 %v1142_v8  ;;  %p1044_p11 = scmp.ne.s32.totalorder %s1438_s27, %s1043_s13  ;;  %p1508_p0 = scmp.ne.s32.totalorder %s1503_s9, 0 }
  0xa2   : > { %s1144_s21 = smov [#allocation12]  }
  0xa3   : > { %755 = vmatpush3.bf16.msra.mxu1 %v888_v9  ;;  %p1045_p5 = pnand %p1044_p11, %p1508_p0  ;;  %s1047_s6 = sshll.u32 %s1144_s21, 4  ;;  %s1048_s6 = int_to_ptr.vmem [resolvable:$false] %s1047_s6 }
  0xa4   : > { %760 = vmatprep.subr.bf16.mxu1 %v1142_v8  ;;  %771 = vmatpush3.bf16.msra.mxu0 %v892_v21  ;;  %v486_v39 = vld [vmem:[#allocation2] sm:$0xff]  ;;  %s1049_s24 = scalar_lea.vmem %s1048_s6, 256  ;;  %p1050_p10 = scmp.lt.s32.totalorder %s1438_s27, %s1048_s6 }
  0xa5   : > { %772 = vmatprep.subr.bf16.mxu0 %v1142_v8  ;;  %p1046_p7 = pneg %p1045_p5  ;;  %p1051_p13 = scmp.lt.s32.totalorder %s1049_s24, %s1043_s13 }
  0xa7   : > { %p1052_p2 = por %p1051_p13, %p1050_p10 }
  0xa8   : > { %773 = vmatpush3.bf16.msra.mxu0 %v893_v22 }
  0xa9   : > { %774 = vmatprep.subr.bf16.mxu0 %v1142_v8  ;;  %p1053_p8 = pnand %p1052_p2, %p1046_p7 }
  0xac   : > { %775 = vmatpush3.bf16.msra.mxu0 %v894_v23 }
 0x12b   : > { %v343_v2 = vpop.xlane.xlu0 %342 }
 0x12c   : > { %v345_v3 = vmul.f32 0.03125, %v343_v2 }
 0x12e   : > { %v346_v4 = vsub.f32 %v332_v0, %v345_v3 }
 0x130   : > { %v347_v5 = vmul.f32 %v346_v4, %v346_v4 }
 0x132   : > { %v348_v6 = vsel %vm337_vm0, %v347_v5, 0.0 }
 0x133   : > { %349 = vadd.xlane.f32.xlu0 %v348_v6 }
 0x1c0   : > { %v350_v10 = vpop.xlane.xlu0 %349 }
 0x1c1   : > { %v351_v11 = vmul.f32 0.03125, %v350_v10 }
 0x1c3   : > { %v352_v12 = vadd.f32 1e-05, %v351_v11 }
 0x1c5   : > { %895 = vrsqrt.f32 %v352_v12 }
 0x1cf   : > { %v896_v13 = vpop.eup %895 }
 0x1d0   : > { %v354_v15 = vmul.f32 %v896_v13, %v346_v4 }
 0x1d2   : > { %v361_v16 = vmul.f32 %v724_v14, %v354_v15 }
 0x1d4   : > { %v362_v18 = vpack.c.bf16 %v361_v16, %v361_v16 }
 0x1d6   : > { %757 = vmatmul.mubr.msk.bf16.vlgmr.msra.gmra.mrb[0].mxu1 %vm337_vm0, %v362_v18 }
 0x1d7   : > { %761 = vmatpush3.bf16.msra.mxu1 %v889_v17  ;;  %764 = vmatprep.mubr.msk.bf16.mxu1 %vm1143_vm1, %v1142_v8 }
 0x1d8   : > { %762 = vmatprep.subr.bf16.mxu1 %v1142_v8 }
 0x1db   : > { %763 = vmatpush3.bf16.msra.mxu1 %v890_v19 }
 0x1de   : > { %765 = vmatmul.mubr.msk.bf16.vlgmr.msra.gmra.mrb[4].mxu1 %vm337_vm0, %v362_v18 }
 0x2a9   : > { %v416_v24 = vpop.f32.mrb[0].mxu1 }
 0x2aa   : > { %v731_v25 = vmul.f32 -1.442695, %v416_v24  ;;  %v758_v26 = vpop.f32.mrb[1].mxu1 }
 0x2ab   : > { %v419_v27 = vpop.f32.mrb[2].mxu1 }
 0x2ac   : > { %897 = vpow2.f32 %v731_v25  ;;  %v759_v28 = vpop.f32.mrb[3].mxu1 }
 0x2b1   : > { %v472_v29 = vpop.f32.mrb[4].mxu1 }
 0x2b2   : > { %v766_v30 = vpop.f32.mrb[5].mxu1 }
 0x2b3   : > { %v475_v31 = vpop.f32.mrb[6].mxu1 }
 0x2b4   : > { %v767_v32 = vpop.f32.mrb[7].mxu1 }
 0x2b6   : > { %v898_v33 = vpop.eup %897 }
 0x2b7   : > { %v481_v34 = vadd.f32 1.0, %v898_v33 }
 0x2b9   : > { %899 = vrcp.f32 %v481_v34 }
 0x2c3   : > { %v900_v35 = vpop.eup %899 }
 0x2c4   : > { %v484_v36 = vmul.f32 %v900_v35, %v416_v24 }
 0x2c6   : > { %v485_v37 = vmul.f32 %v484_v36, %v472_v29 }
 0x2c8   : > { %v487_v38 = vpack.c.bf16 %v485_v37, %v485_v37 }
 0x2ca   : > { %777 = vmatmul.mubr.msk.bf16.vlgmr.msra.gmra.mrb[0].mxu0 %vm520_vm2, %v487_v38 }
 0x39d   : > { %v558_v40 = vpop.f32.mrb[0].mxu0 }
 0x39e   : > { %v564_v41 = vadd.f32 %v558_v40, %v486_v39  ;;  %v778_v42 = vpop.f32.mrb[1].mxu0 }
 0x39f   : > { %v561_v43 = vpop.f32.mrb[2].mxu0 }
 0x3a0   : > { %565 = vst.msk [vmem:[#allocation2] sm:$0xff] %vm337_vm0, %v564_v41  ;;  %v779_v44 = vpop.f32.mrb[3].mxu0 }
 0x3a7   : > { %v569_v45 = vld [vmem:[#allocation2] sm:$0xff] }
 0x3a8   : > { %570 = vst.msk [vmem:[%s329_s26] sm:$0xff] %vm337_vm0, %v569_v45 }
 0x3a9   : > { %1056 = shalt.err (!%p1053_p8)
}
 0x3aa   : > { %s1057_s15 = scalar_lea.hbm %s1436_s29, 128  ;;  %s1061_s16 = scalar_lea.hbm %s1491_s5, 256 }
 0x3ab   : > { %p1058_p9 = scmp.ne.s32.totalorder %s1436_s29, %s1057_s15  ;;  %p1062_p3 = scmp.lt.u32.totalorder %s1436_s29, %s1491_s5 }
 0x3ac   : > { %p1063_p1 = scmp.lt.u32.totalorder %s1061_s16, %s1057_s15  ;;  %p1065_p11 = scmp.lt.u32.totalorder %s1057_s15, %s1436_s29 }
 0x3ad   : > { %p1059_p4 = pnand %p1058_p9, %p1508_p0 }
 0x3ae   : > { %p1064_p12 = por %p1063_p1, %p1062_p3 }
 0x3af   : > { %p1060_p6 = pneg %p1059_p4 }
 0x3b0   : > { %p1066_p5 = por %p1065_p11, %p1064_p12 }
 0x3b2   : > { %p1067_p7 = pnand %p1066_p5, %p1060_p6 }
 0x3b4   : > { %1070 = shalt.err (!%p1067_p7)
}
 0x3b5   : > { %798 = dma.vmem_to_hbm [thread:$0]  (%p1508_p0), %s1438_s27, 128, %s1436_s29, %s572_s7  }
 0x3b6 PF: > { %s597_s26 = sand.u32 1, %s1113_s18   ;;  %p1509_p10 = scmp.ne.s32.totalorder %s1504_s12, 0 }
 0x3b7   : > { %p1510_p13 = scmp.ge.s32.totalorder %s1133_s23, 2  ;;  %s598_s8 = scalar_lea.sflag [#allocation5], %s597_s26 }
 0x3b9   : > { %p818_p2 = pnand %p1510_p13, %p1509_p10 }
 0x3bb   : > { %1108 = dma.done.wait (!%p818_p2), %s598_s8, 128  }
 0x3bc   : > { %1110 = vsyncadd (!%p818_p2), %s598_s8, 4294967168  ;;  %s23_s23 = sadd.s32 1, %s1133_s23   ;;  %s1511_s18 = smov %s1117_s19 }
 0x3bd   : > { %p20_p8 = scmp.ge.s32.totalorder %s23_s23, 4   ;;  %s1512_s19 = smov %s1121_s20 }
 0x3be   : > { %s1513_s20 = smov %s1353_s11  ;;  %s1514_s21 = smov %s1129_s22 }
 0x3bf   : > { %s1515_s22 = smov %s1517_s14  ;;  %22 = sbr.rel (!%p20_p8) target bundleno = 8 (0x8), region = 112 }
 0x3c6   :  { %603 = vsyncpa [#allocation4], 1 }
 0x3c7   :  { %605 = vsyncpa [#allocation4 + $0x1], 1 }
 0x3c8   :  { %606 = vsyncpa [#allocation7], 1 }
 0x3c9   :  { %607 = vsyncpa [#allocation10], 1 }
 0x3ca   :  { %608 = vsyncpa [#allocation5], 1 }
 0x3cb   :  { %610 = vsyncpa [#allocation5 + $0x1], 1 }

// kernel: stu_block_forward.3
= control target key start
LH: loop header
LB: loop body
LE: loop exit
PB: predicated region body
PF: predicated region fallthrough
CT: control target
= control target key end

     0   :  { %s2443_s0 = inlined_call_operand.hbm [shape: f32[2,8,32], index: 0, kind: input, shape index: {}, may-alias: {0,1}]   ;;  %s2444_s1 = inlined_call_operand.hbm [shape: f32[2,8,32], index: 1, kind: input, shape index: {}, may-alias: {0,1}]   ;;  %s2445_s2 = inlined_call_operand.hbm [shape: f32[1,32], index: 2, kind: input, shape index: {}]   ;;  %s2446_s3 = inlined_call_operand.hbm [shape: f32[1,32], index: 3, kind: input, shape index: {}]   ;;  %s2447_s4 = inlined_call_operand.hbm [shape: f32[1,32], index: 4, kind: input, shape index: {}]   ;;  %s2448_s5 = inlined_call_operand.hbm [shape: bf16[7,8,8], index: 5, kind: input, shape index: {}]   ;;  %s2449_s6 = inlined_call_operand.hbm [shape: bf16[224,32], index: 6, kind: input, shape index: {}]   ;;  %s2450_s7 = inlined_call_operand.hbm [shape: f32[2,8,32], index: 7, kind: output, shape index: {0}]   ;;  %s2451_s8 = inlined_call_operand.hbm [shape: bf16[2,8,32], index: 8, kind: output, shape index: {1}]  }
   0x1   :  { %2458 = sst [smem:[#allocation26_spill]] %s2445_s2 }
   0x2   :  { %2459 = sst [smem:[#allocation27_spill]] %s2446_s3 }
   0x3   :  { %2460 = sst [smem:[#allocation28_spill]] %s2447_s4 }
   0x4   :  { %2461 = sst [smem:[#allocation29_spill]] %s2448_s5 }
   0x5   :  { %2462 = sst [smem:[#allocation30_spill]] %s2449_s6 }
   0x6   :  { %2463 = sst [smem:[#allocation31_spill]] %s2450_s7 }
   0x7   :  { %2464 = sst [smem:[#allocation32_spill]] %s2451_s8 }
   0x8   :  { %14 = vsyncpa [#allocation5], 0 }
   0x9   :  { %16 = vsyncpa [#allocation5 + $0x1], 0 }
   0xa   :  { %17 = vsyncpa [#allocation8], 0 }
   0xb   :  { %19 = vsyncpa [#allocation8 + $0x1], 0 }
   0xc   :  { %20 = vsyncpa [#allocation11], 0 }
   0xd   :  { %21 = vsyncpa [#allocation14], 0 }
   0xe   :  { %22 = vsyncpa [#allocation6], 0 }
   0xf   :  { %24 = vsyncpa [#allocation6 + $0x1], 0 }
  0x10   :  { %25 = vsyncpa [#allocation18], 0 }
  0x11   :  { %27 = vsyncpa [#allocation18 + $0x1], 0  ;;  %s2008_s27 = smov 0   ;;  %s2010_s28 = smov 0  }
  0x12   :  { %s2012_s29 = smov 0   ;;  %s2014_s30 = smov 0  }
  0x13   :  { %s2016_s9 = smov 0   ;;  %s2018_s10 = smov 0  }
  0x14 LB: > { %s2039_s11 = sadd.s32 4294967295, %s1944_s10   ;;  %p1338_p0 = scmp.ge.s32.totalorder %s1944_s10, 1  ;;  %s1944_s10 = sphi %s2018_s10, %s33_s10   ;;  %s1940_s9 = sphi %s2016_s9, %s2496_s9   ;;  %s1936_s30 = sphi %s2014_s30, %s2495_s30   ;;  %s1932_s29 = sphi %s2012_s29, %s2494_s29   ;;  %s1928_s28 = sphi %s2010_s28, %s2493_s28   ;;  %s1924_s27 = sphi %s2008_s27, %s2492_s27  }
  0x15   : > { %p2452_p1 = scmp.eq.s32.totalorder %s2039_s11, 0  ;;  %p281_p2 = scmp.lt.s32.totalorder %s1944_s10, 3 }
  0x16   : > { %s1946_s13 = smov [#allocation9]   ;;  %s1947_s15 = smov [#allocation10]  }
  0x17   : > { %p2044_p3 = pnand %p1338_p0, %p281_p2  ;;  %s294_s14 = sshll.u32 %s1946_s13, 4  ;;  %s295_s14 = int_to_ptr.vmem [resolvable:$true] %s294_s14 }
  0x18   : > { %s305_s16 = sshll.u32 %s1947_s15, 4  ;;  %s1948_s18 = smov [#allocation13]   ;;  %s2057_s16 = int_to_ptr.vmem [resolvable:$true] %s305_s16 }
  0x19   : > { %s2465_s12 = scalar_select %p2044_p3, 1, 0 }
  0x1a   : > { %p1487_p5 = pneg %p2044_p3  ;;  %s329_s19 = sshll.u32 %s1948_s18, 4  ;;  %s2059_s19 = int_to_ptr.vmem [resolvable:$true] %s329_s19 }
  0x1b   : > { %s2467_s2 = sld [smem:[#allocation26_spill]] }
  0x1c   : > { %p2053_p6 = pnand %p1487_p5, %p2452_p1 }
  0x1e   : > { %p2069_p8 = pneg %p2053_p6 }
  0x21   : > { %s1614_s22 = scalar_lea.hbm %s2467_s2, 16 }
  0x22   : > { %p1615_p7 = scmp.ne.s32.totalorder %s2467_s2, %s1614_s22  ;;  %p1621_p11 = scmp.lt.u32.totalorder %s1614_s22, %s2467_s2 }
  0x24   : > { %p1617_p9 = pnand %p2069_p8, %p1615_p7 }
  0x26   : > { %p1618_p10 = pneg %p1617_p9 }
  0x28   : > { %p1623_p12 = pnand %p1621_p11, %p1618_p10 }
  0x2a   : > { %1626 = shalt.err (!%p1623_p12)
}
  0x2b   : > { %s1627_s15 = scalar_lea.vmem %s295_s14, 16  ;;  %s1634_s18 = scalar_lea.vmem %s295_s14, 32 }
  0x2c   : > { %p1628_p13 = scmp.ne.s32.totalorder %s295_s14, %s1627_s15  ;;  %p1635_p5 = scmp.lt.s32.totalorder %s295_s14, %s295_s14 }
  0x2d   : > { %p1636_p4 = scmp.lt.s32.totalorder %s1634_s18, %s1627_s15 }
  0x2e   : > { %p1630_p0 = pnand %p1628_p13, %p2069_p8 }
  0x2f   : > { %p1637_p1 = por %p1636_p4, %p1635_p5 }
  0x30   : > { %p1631_p2 = pneg %p1630_p0 }
  0x32   : > { %p1638_p3 = pnand %p1637_p1, %p1631_p2 }
  0x34   : > { %1641 = shalt.err (!%p1638_p3)
}
  0x35   : > { %1490 = dma.hbm_to_vmem [thread:$0]  (!%p2053_p6), %s2467_s2, 16, %s295_s14, [#allocation8]  }
  0x36   : > { %s2469_s3 = sld [smem:[#allocation27_spill]] }
  0x3c   : > { %s1642_s24 = scalar_lea.hbm %s2469_s3, 16 }
  0x3d   : > { %p1643_p7 = scmp.ne.s32.totalorder %s2469_s3, %s1642_s24  ;;  %p1649_p1 = scmp.lt.u32.totalorder %s1642_s24, %s2469_s3 }
  0x3f   : > { %p1645_p9 = pnand %p1643_p7, %p2069_p8 }
  0x41   : > { %p1646_p4 = pneg %p1645_p9 }
  0x43   : > { %p1651_p3 = pnand %p1649_p1, %p1646_p4 }
  0x45   : > { %1654 = shalt.err (!%p1651_p3)
}
  0x46   : > { %s1655_s14 = scalar_lea.vmem %s2057_s16, 16  ;;  %s1662_s20 = scalar_lea.vmem %s2057_s16, 32 }
  0x47   : > { %p1656_p10 = scmp.ne.s32.totalorder %s2057_s16, %s1655_s14  ;;  %p1663_p13 = scmp.lt.s32.totalorder %s2057_s16, %s2057_s16 }
  0x48   : > { %p1664_p0 = scmp.lt.s32.totalorder %s1662_s20, %s1655_s14 }
  0x49   : > { %p1658_p11 = pnand %p1656_p10, %p2069_p8 }
  0x4a   : > { %p1665_p2 = por %p1664_p0, %p1663_p13 }
  0x4b   : > { %p1659_p12 = pneg %p1658_p11 }
  0x4d   : > { %p1666_p5 = pnand %p1665_p2, %p1659_p12 }
  0x4f   : > { %1669 = shalt.err (!%p1666_p5)
}
  0x50   : > { %1493 = dma.hbm_to_vmem [thread:$0]  (!%p2053_p6), %s2469_s3, 16, %s2057_s16, [#allocation11]  }
  0x51   : > { %s2470_s5 = sld [smem:[#allocation29_spill]] }
  0x57   : > { %s1670_s26 = scalar_lea.hbm %s2470_s5, 448 }
  0x58   : > { %p1671_p7 = scmp.ne.s32.totalorder %s2470_s5, %s1670_s26  ;;  %p1677_p1 = scmp.lt.u32.totalorder %s1670_s26, %s2470_s5 }
  0x5a   : > { %p1673_p9 = pnand %p1671_p7, %p2069_p8 }
  0x5c   : > { %p1674_p4 = pneg %p1673_p9 }
  0x5e   : > { %p1679_p3 = pnand %p1677_p1, %p1674_p4 }
  0x60   : > { %1682 = shalt.err (!%p1679_p3)
}
  0x61   : > { %s1683_s16 = scalar_lea.vmem %s2059_s19, 448  ;;  %p1691_p13 = scmp.lt.s32.totalorder %s2059_s19, %s2059_s19 }
  0x62   : > { %p1684_p10 = scmp.ne.s32.totalorder %s2059_s19, %s1683_s16  ;;  %p1692_p0 = scmp.lt.s32.totalorder %s1683_s16, %s1683_s16 }
  0x64   : > { %p1686_p11 = pnand %p1684_p10, %p2069_p8  ;;  %p1693_p2 = por %p1692_p0, %p1691_p13 }
  0x66   : > { %p1687_p12 = pneg %p1686_p11 }
  0x68   : > { %p1694_p5 = pnand %p1693_p2, %p1687_p12 }
  0x6a   : > { %1697 = shalt.err (!%p1694_p5)
}
  0x6b   : > { %s1949_s20 = smov 64   ;;  %s1950_s21 = smov 4  }
  0x6c   : > { %1499 = dma.hbm_to_vmem [thread:$0]  (!%p2053_p6), %s2470_s5, 448, %s2059_s19, [#allocation14], %s1949_s20, %s1949_s20, %s1950_s21  }
  0x6d   : > { %s1951_s24 = smov [#allocation12]   ;;  %s1952_s13 = smov [#allocation15]  }
  0x6e   : > { %s316_s26 = sshll.u32 %s1951_s24, 4  ;;  %s342_s15 = sshll.u32 %s1952_s13, 4  ;;  %s317_s26 = int_to_ptr.vmem [resolvable:$true] %s316_s26  ;;  %s343_s15 = int_to_ptr.vmem [resolvable:$true] %s342_s15 }
  0x6f   : > { %s2471_s4 = sld [smem:[#allocation28_spill]] }
  0x75   : > { %s1698_s16 = scalar_lea.hbm %s2471_s4, 16 }
  0x76   : > { %p1699_p7 = scmp.ne.s32.totalorder %s2471_s4, %s1698_s16  ;;  %p1705_p1 = scmp.lt.u32.totalorder %s1698_s16, %s2471_s4 }
  0x78   : > { %p1701_p9 = pnand %p1699_p7, %p2069_p8 }
  0x7a   : > { %p1702_p4 = pneg %p1701_p9 }
  0x7c   : > { %p1707_p3 = pnand %p1705_p1, %p1702_p4 }
  0x7e   : > { %1710 = shalt.err (!%p1707_p3)
}
  0x7f   : > { %s1711_s19 = scalar_lea.vmem %s317_s26, 16  ;;  %s1718_s22 = scalar_lea.vmem %s317_s26, 32 }
  0x80   : > { %p1712_p10 = scmp.ne.s32.totalorder %s317_s26, %s1711_s19  ;;  %p1719_p13 = scmp.lt.s32.totalorder %s317_s26, %s317_s26 }
  0x81   : > { %p1720_p0 = scmp.lt.s32.totalorder %s1718_s22, %s1711_s19 }
  0x82   : > { %p1714_p11 = pnand %p1712_p10, %p2069_p8 }
  0x83   : > { %p1721_p2 = por %p1720_p0, %p1719_p13 }
  0x84   : > { %p1715_p12 = pneg %p1714_p11 }
  0x86   : > { %p1722_p5 = pnand %p1721_p2, %p1715_p12 }
  0x88   : > { %1725 = shalt.err (!%p1722_p5)
}
  0x89   : > { %1496 = dma.hbm_to_vmem [thread:$0]  (!%p2053_p6), %s2471_s4, 16, %s317_s26, [#allocation11]  }
  0x8a   : > { %s2472_s6 = sld [smem:[#allocation30_spill]] }
  0x90   : > { %s1726_s23 = scalar_lea.hbm %s2472_s6, 1792 }
  0x91   : > { %p1727_p7 = scmp.ne.s32.totalorder %s2472_s6, %s1726_s23  ;;  %p1733_p1 = scmp.lt.u32.totalorder %s1726_s23, %s2472_s6 }
  0x93   : > { %p1729_p9 = pnand %p1727_p7, %p2069_p8 }
  0x95   : > { %p1730_p4 = pneg %p1729_p9 }
  0x97   : > { %p1735_p3 = pnand %p1733_p1, %p1730_p4 }
  0x99   : > { %1738 = shalt.err (!%p1735_p3)
}
  0x9a   : > { %s1739_s16 = scalar_lea.vmem %s343_s15, 1792  ;;  %p1747_p13 = scmp.lt.s32.totalorder %s343_s15, %s343_s15 }
  0x9b   : > { %p1740_p10 = scmp.ne.s32.totalorder %s343_s15, %s1739_s16  ;;  %p1748_p0 = scmp.lt.s32.totalorder %s1739_s16, %s1739_s16 }
  0x9d   : > { %p1742_p11 = pnand %p1740_p10, %p2069_p8  ;;  %p1749_p2 = por %p1748_p0, %p1747_p13 }
  0x9f   : > { %p1743_p12 = pneg %p1742_p11 }
  0xa1   : > { %p1750_p5 = pnand %p1749_p2, %p1743_p12 }
  0xa3   : > { %1753 = shalt.err (!%p1750_p5)
}
  0xa4   : > { %1502 = dma.hbm_to_vmem [thread:$0]  (!%p2053_p6), %s2472_s6, 1792, %s343_s15, [#allocation14], %s1949_s20, %s1949_s20, %s1950_s21  }
  0xa5   : > { %s1337_s17 = sadd.s32 4294967294, %s1944_s10   ;;  %s52_s25 = sadd.s32 1, %s1940_s9 }
  0xa6   : > { %s61_s22 = sadd.s32 1, %s1932_s29  ;;  %p54_p8 = scmp.ge.s32.totalorder %s52_s25, 2 }
  0xa7   : > { %p68_p7 = scmp.ne.s32.totalorder %s1932_s29, %s1928_s28  ;;  %p69_p9 = scmp.eq.s32.totalorder %s1944_s10, 0 }
  0xa8   : > { %p74_p4 = scmp.ne.s32.totalorder %s1928_s28, %s1924_s27  ;;  %s2498_s25 = smov (%p54_p8, %s52_s25), 0 }
  0xa9   : > { %p2184_p1 = por %p69_p9, %p68_p7  ;;  %p2474_p3 = scmp.eq.s32.totalorder %s2039_s11, 0 }
  0xaa   : > { %s56_s21 = ssub.s32 %s1940_s9, %s2498_s25  ;;  %p240_p10 = scmp.eq.s32.totalorder %s2039_s11, 1 }
  0xab   : > { %p2190_p6 = por %p2474_p3, %p74_p4  ;;  %p59_p11 = scmp.eq.s32.totalorder %s56_s21, 0 }
  0xac   : > { %p246_p12 = scmp.eq.s32.totalorder %s1337_s17, 1  ;;  %p2197_p13 = por %p240_p10, %p68_p7 }
  0xad   : > { %s2475_s20 = scalar_select %p2190_p6, 1, 0 }
  0xae   : > { %s2476_s15 = scalar_select %p2197_p13, 1, 0 }
  0xaf   : > { %p1522_p0 = scmp.lt.s32.totalorder %s1944_s10, 2  ;;  %p2205_p2 = por %p246_p12, %p74_p4 }
  0xb0   : > { %s2203_s3 = scalar_select %p59_p11, %s1932_s29, %s61_s22  }
  0xb1   : > { %s2477_s7 = scalar_select %p2205_p2, 1, 0 }
  0xb2   : > { %s356_s8 = sand.u32 1, %s1932_s29   ;;  %s1346_s24 = sshll.u32 %s1940_s9, 7 }
  0xb3   : > { %s2210_s23 = sshll.u32 %s356_s8, 3  ;;  %s2216_s14 = scalar_lea.hbm %s2443_s0, %s1346_s24 }
  0xb4   : > { %s360_s16 = scalar_lea.vmem [#allocation4], %s2210_s23  ;;  %p2223_p5 = pnand %p1522_p0, %p2184_p1 }
  0xb5   : > { %s368_s26 = sshll.u32 %s360_s16, 4  ;;  %s2230_s21 = scalar_lea.hbm %s2444_s1, %s1346_s24  ;;  %s2219_s26 = int_to_ptr.vmem [resolvable:$true] %s368_s26 }
  0xb6   : > { %s375_s13 = sand.u32 1, %s1944_s10   ;;  %s357_s18 = scalar_lea.sflag [#allocation5], %s356_s8 }
  0xb7   : > { %s1754_s4 = scalar_lea.hbm %s2216_s14, 128  ;;  %p1756_p7 = pneg %p2223_p5 }
  0xb8   : > { %p1755_p8 = scmp.ne.s32.totalorder %s2216_s14, %s1754_s4  ;;  %s1759_s5 = scalar_lea.hbm %s2443_s0, 256 }
  0xb9   : > { %p1760_p1 = scmp.lt.u32.totalorder %s2216_s14, %s2443_s0  ;;  %p1761_p3 = scmp.lt.u32.totalorder %s1759_s5, %s1754_s4 }
  0xba   : > { %p1757_p9 = pnand %p1756_p7, %p1755_p8  ;;  %p1763_p11 = scmp.lt.u32.totalorder %s1754_s4, %s2216_s14 }
  0xbb   : > { %p1762_p10 = por %p1761_p3, %p1760_p1 }
  0xbc   : > { %p1758_p4 = pneg %p1757_p9 }
  0xbd   : > { %p1764_p12 = por %p1763_p11, %p1762_p10 }
  0xbf   : > { %p1765_p0 = pnand %p1764_p12, %p1758_p4 }
  0xc1   : > { %1768 = shalt.err (!%p1765_p0)
}
  0xc2   : > { %s1769_s8 = scalar_lea.vmem %s2219_s26, 128  ;;  %s1953_s24 = smov [#allocation4]  }
  0xc3   : > { %p1770_p8 = scmp.ne.s32.totalorder %s2219_s26, %s1769_s8  ;;  %s1774_s22 = sshll.u32 %s1953_s24, 4  ;;  %s1775_s22 = int_to_ptr.vmem [resolvable:$false] %s1774_s22 }
  0xc4   : > { %s1776_s6 = scalar_lea.vmem %s1775_s22, 256  ;;  %p1777_p13 = scmp.lt.s32.totalorder %s2219_s26, %s1775_s22 }
  0xc5   : > { %p1772_p9 = pnand %p1770_p8, %p1756_p7  ;;  %p1778_p1 = scmp.lt.s32.totalorder %s1776_s6, %s1769_s8 }
  0xc7   : > { %p1773_p2 = pneg %p1772_p9  ;;  %p1779_p3 = por %p1778_p1, %p1777_p13 }
  0xc9   : > { %p1780_p10 = pnand %p1779_p3, %p1773_p2 }
  0xcb   : > { %1783 = shalt.err (!%p1780_p10)
}
  0xcc   : > { %1506 = dma.hbm_to_vmem [thread:$0]  (!%p2223_p5), %s2216_s14, 128, %s2219_s26, %s357_s18  }
  0xcd   : > { %s379_s4 = scalar_lea.vmem [#allocation7], %s2210_s23  ;;  %s376_s2 = scalar_lea.sflag [#allocation8], %s375_s13 }
  0xce   : > { %s387_s5 = sshll.u32 %s379_s4, 4  ;;  %s1784_s16 = scalar_lea.hbm %s2230_s21, 128  ;;  %s388_s5 = int_to_ptr.vmem [resolvable:$true] %s387_s5 }
  0xcf   : > { %p1785_p13 = scmp.ne.s32.totalorder %s2230_s21, %s1784_s16  ;;  %s1789_s24 = scalar_lea.hbm %s2444_s1, 256 }
  0xd0   : > { %p1790_p11 = scmp.lt.u32.totalorder %s2230_s21, %s2444_s1  ;;  %p1791_p12 = scmp.lt.u32.totalorder %s1789_s24, %s1784_s16 }
  0xd1   : > { %p1787_p2 = pnand %p1785_p13, %p1756_p7  ;;  %p1793_p8 = scmp.lt.u32.totalorder %s1784_s16, %s2230_s21 }
  0xd2   : > { %p1792_p0 = por %p1791_p12, %p1790_p11 }
  0xd3   : > { %p1788_p4 = pneg %p1787_p2 }
  0xd4   : > { %p1794_p9 = por %p1793_p8, %p1792_p0 }
  0xd6   : > { %p1795_p1 = pnand %p1794_p9, %p1788_p4 }
  0xd8   : > { %1798 = shalt.err (!%p1795_p1)
}
  0xd9   : > { %s1799_s23 = scalar_lea.vmem %s388_s5, 128  ;;  %s1954_s14 = smov [#allocation7]  }
  0xda   : > { %p1800_p3 = scmp.ne.s32.totalorder %s388_s5, %s1799_s23  ;;  %s1804_s26 = sshll.u32 %s1954_s14, 4  ;;  %s1805_s26 = int_to_ptr.vmem [resolvable:$false] %s1804_s26 }
  0xdb   : > { %s1806_s13 = scalar_lea.vmem %s1805_s26, 256  ;;  %p1807_p2 = scmp.lt.s32.totalorder %s388_s5, %s1805_s26 }
  0xdc   : > { %p1802_p10 = pnand %p1800_p3, %p1756_p7  ;;  %p1808_p6 = scmp.lt.s32.totalorder %s1806_s13, %s1799_s23 }
  0xde   : > { %p1803_p13 = pneg %p1802_p10  ;;  %p1809_p11 = por %p1808_p6, %p1807_p2 }
  0xe0   : > { %p1810_p12 = pnand %p1809_p11, %p1803_p13 }
  0xe2   : > { %1813 = shalt.err (!%p1810_p12)
}
  0xe3   : > { %1509 = dma.hbm_to_vmem [thread:$0]  (!%p2223_p5), %s2230_s21, 128, %s388_s5, %s376_s2  }
  0xe4   : > { %p2479_p4 = scmp.ne.s32.totalorder %s2465_s12, 0 }
  0xe5   : > { %s2283_s18 = sand.u32 (!%p2479_p4), 1, %s1928_s28   ;;  %p2480_p6 = scmp.ne.s32.totalorder (!%p2479_p4), %s2475_s20, 0 }
  0xe6   : > { %396 = sbr.rel (%p2479_p4) target bundleno = 1816 (0x718), region = 48  ;;  %s2286_s4 = sshll.u32 (!%p2479_p4), %s2283_s18, 3 }
  0xe7   : > { %s399_s16 = scalar_lea.sflag (!%p2479_p4), [#allocation5], %s2283_s18  ;;  %s402_s17 = scalar_lea.vmem (!%p2479_p4), [#allocation4], %s2286_s4 }
  0xed   : > { %1895 = dma.done.wait (%p2480_p6), %s399_s16, 128  }
  0xee   : > { %1897 = vsyncadd (%p2480_p6), %s399_s16, 4294967168  ;;  %s407_s12 = sand.u32 1, %s2039_s11   ;;  %s411_s21 = scalar_lea.vmem [#allocation7], %s2286_s4 }
  0xef   : > { %s408_s19 = scalar_lea.sflag [#allocation8], %s407_s12 }
  0xf0   : > { %1899 = dma.done.wait (%p2480_p6), %s408_s19, 128  }
  0xf1   : > { %1901 = vsyncadd (%p2480_p6), %s408_s19, 4294967168  ;;  %p2481_p5 = scmp.eq.s32.totalorder %s2039_s11, 0 }
  0xf3   : > { %1903 = dma.done.wait (%p2481_p5), [#allocation8], 16   ;;  %p2482_p7 = pmov %p2481_p5 }
  0xf4   : > { %p2483_p0 = pmov %p2481_p5 }
  0xf5   : > { %1905 = vsyncadd (%p2482_p7), [#allocation8], 4294967280 }
  0xf6   : > { %1907 = dma.done.wait (%p2483_p0), [#allocation11], 32   ;;  %p2484_p8 = pmov %p2483_p0 }
  0xf7   : > { %p2485_p9 = pmov %p2483_p0 }
  0xf8   : > { %1909 = vsyncadd (%p2484_p8), [#allocation11], 4294967264 }
  0xf9   : > { %1911 = dma.done.wait (%p2485_p9), [#allocation14], 2240   ;;  %p2486_p1 = pmov %p2483_p0 }
  0xfa   : > { %vm479_vm0 = vcmask 261120   ;;  %v506_v0 = vld [vmem:[%s411_s21] sm:$0xff]  ;;  %v2314_v11 = vld [vmem:[#allocation9] ss:$0 sm:$0xff]  ;;  %v1955_v20 = vmov 0.0   ;;  %vm1956_vm1 = vmmov 0  }
  0xfb   : > { %1913 = vsyncadd (%p2486_p1), [#allocation14], 4294965056  ;;  %v509_v1 = vsel %vm479_vm0, %v506_v0, 0.0  ;;  %1417 = vmatprep.subr.bf16.mxu0 %v1955_v20  ;;  %480 = vst.msk [vmem:[#allocation2] sm:$0xff] %vm479_vm0, %v1955_v20  ;;  %1419 = vmatprep.mubr.msk.bf16.mxu0 %vm1956_vm1, %v1955_v20  ;;  %v1361_v25 = vld [vmem:[#allocation10] ss:$0 sm:$0xff] }
  0xfc   : > { %510 = vadd.xlane.f32.xlu0 %v509_v1  ;;  %vm557_vm2 = vcmask 1043456   ;;  %v552_v30 = vld [vmem:[#allocation13] sm:$0xf]  ;;  %vm553_vm3 = vcmask 64512   ;;  %v605_v31 = vld [vmem:[#allocation13 + $0x4] sm:$0xf] }
  0xfd   : > { %v659_v32 = vld [vmem:[#allocation13 + $0x8] sm:$0xf]  ;;  %v713_v33 = vld [vmem:[#allocation13 + $0xc] sm:$0xf]  ;;  %v767_v34 = vld [vmem:[#allocation13 + $0x10] sm:$0xf] }
  0xfe   : > { %v814_v35 = vld [vmem:[#allocation13 + $0x14] sm:$0xf]  ;;  %v867_v36 = vld [vmem:[#allocation13 + $0x18] sm:$0xf]  ;;  %v1590_v37 = vld [vmem:[#allocation15] sm:$0xff]   ;;  %v1957_v38 = vmov 0  }
  0xff   : > { %1043 = vmatprep.subr.bf16.mxu1 %v1957_v38  ;;  %v1591_v39 = vld [vmem:[#allocation15 + $0x8] sm:$0xff]   ;;  %v1592_v40 = vld [vmem:[#allocation15 + $0x10] sm:$0xff]   ;;  %vm602_vm4 = vcmask 257024   ;;  %v1593_v42 = vld [vmem:[#allocation15 + $0x18] sm:$0xff]   ;;  %s1958_s11 = smov 32   ;;  %s1959_s20 = smov 64  }
 0x100   : > { %1044 = vmatpush1.bf16.msra.mxu1 %v1590_v37  ;;  %v1594_v47 = vld [vmem:[#allocation15 + $0x20] sm:$0xff]   ;;  %v1595_v49 = vld [vmem:[#allocation15 + $0x28] sm:$0xff]   ;;  %v1596_v54 = vld [vmem:[#allocation15 + $0x30] sm:$0xff]   ;;  %s1960_s5 = smov 96   ;;  %vm656_vm5 = vcmask 519424   ;;  %vm710_vm6 = vcmask 781824  }
 0x101   : > { %1045 = vmatprep.subr.bf16.mxu1 %v1957_v38  ;;  %v1597_v56 = vld [vmem:[#allocation15 + $0x38] sm:$0xff]   ;;  %v1598_v61 = vld [vmem:[#allocation15 + $0x40] sm:$0xff]   ;;  %vm764_vm7 = vcmask 1044224   ;;  %vm1039_vm8 = vcmask 785408   ;;  %s466_s2 = scalar_lea.vmem [#allocation16], %s2286_s4  ;;  %s1394_s8 = sshll.u32 %s1936_s30, 7 }
 0x102   : > { %s2487_s6 = sld [smem:[#allocation31_spill]]  ;;  %s1132_s14 = sshll.u32 %s466_s2, 4  ;;  %s1133_s14 = int_to_ptr.vmem [resolvable:$true] %s1132_s14 }
 0x103   : > { %s1113_s26 = scalar_lea.sflag [#allocation6], %s2283_s18  ;;  %s1814_s13 = scalar_lea.vmem %s1133_s14, 128 }
 0x104   : > { %1046 = vmatpush1.bf16.msra.mxu1 %v1591_v39  ;;  %p1815_p3 = scmp.ne.s32.totalorder %s1133_s14, %s1814_s13  ;;  %p2488_p10 = scmp.ne.s32.totalorder %s2476_s15, 0 }
 0x105   : > { %1047 = vmatprep.subr.bf16.mxu1 %v1957_v38  ;;  %s1961_s16 = smov [#allocation16]  }
 0x106   : > { %p1816_p13 = pnand %p1815_p3, %p2488_p10 }
 0x108   : > { %1048 = vmatpush1.bf16.msra.mxu1 %v1592_v40  ;;  %s2368_s23 = scalar_lea.hbm %s2487_s6, %s1394_s8  ;;  %p1817_p2 = pneg %p1816_p13 }
 0x109   : > { %1049 = vmatprep.subr.bf16.mxu1 %v1957_v38 }
 0x10c   : > { %1050 = vmatpush1.bf16.msra.mxu1 %v1593_v42 }
 0x10d   : > { %1051 = vmatprep.subr.bf16.mxu1 %v1957_v38 }
 0x110   : > { %1052 = vmatpush1.bf16.msra.mxu1 %v1594_v47 }
 0x111   : > { %1053 = vmatprep.subr.bf16.mxu1 %v1957_v38 }
 0x114   : > { %1054 = vmatpush1.bf16.msra.mxu1 %v1595_v49 }
 0x115   : > { %1055 = vmatprep.subr.bf16.mxu1 %v1957_v38 }
 0x118   : > { %1056 = vmatpush1.bf16.msra.mxu1 %v1596_v54 }
 0x119   : > { %1057 = vmatprep.subr.bf16.mxu1 %v1957_v38 }
 0x11c   : > { %1058 = vmatpush1.bf16.msra.mxu1 %v1597_v56 }
 0x11d   : > { %1059 = vmatprep.subr.bf16.mxu1 %v1957_v38 }
 0x120   : > { %1060 = vmatpush1.bf16.msra.mxu1 %v1598_v61 }
 0x121   : > { %1061 = vmatprep.subr.bf16.mxu1 %v1957_v38 }
 0x189   : > { %v511_v2 = vpop.xlane.xlu0 %510 }
 0x18a   : > { %v513_v3 = vmul.f32 0.03125, %v511_v2  ;;  %v1599_v2 = vld [vmem:[#allocation15 + $0x48] sm:$0xff]  }
 0x18b   : > { %1062 = vmatpush1.bf16.msra.mxu1 %v1599_v2 }
 0x18c   : > { %v514_v4 = vsub.f32 %v506_v0, %v513_v3  ;;  %1063 = vmatprep.subr.bf16.mxu1 %v1957_v38 }
 0x18e   : > { %v515_v5 = vmul.f32 %v514_v4, %v514_v4 }
 0x190   : > { %v516_v6 = vsel %vm479_vm0, %v515_v5, 0.0 }
 0x191   : > { %517 = vadd.xlane.f32.xlu0 %v516_v6  ;;  %v1600_v6 = vld [vmem:[#allocation15 + $0x50] sm:$0xff]  }
 0x192   : > { %1064 = vmatpush1.bf16.msra.mxu1 %v1600_v6 }
 0x193   : > { %1065 = vmatprep.subr.bf16.mxu1 %v1957_v38 }
 0x21e   : > { %v518_v7 = vpop.xlane.xlu0 %517 }
 0x21f   : > { %v519_v8 = vmul.f32 0.03125, %v518_v7 }
 0x221   : > { %v520_v9 = vadd.f32 1e-05, %v519_v8 }
 0x223   : > { %1606 = vrsqrt.f32 %v520_v9  ;;  %v1601_v9 = vld [vmem:[#allocation15 + $0x58] sm:$0xff]  }
 0x224   : > { %1066 = vmatpush1.bf16.msra.mxu1 %v1601_v9 }
 0x225   : > { %1067 = vmatprep.subr.bf16.mxu1 %v1957_v38 }
 0x22d   : > { %v1607_v10 = vpop.eup %1606 }
 0x22e   : > { %v522_v12 = vmul.f32 %v1607_v10, %v514_v4  ;;  %v1602_v10 = vld [vmem:[#allocation15 + $0x60] sm:$0xff]  }
 0x22f   : > { %1068 = vmatpush1.bf16.msra.mxu1 %v1602_v10 }
 0x230   : > { %v529_v13 = vmul.f32 %v2314_v11, %v522_v12  ;;  %1069 = vmatprep.subr.bf16.mxu1 %v1957_v38 }
 0x232   : > { %v531_v14 = vsel %vm479_vm0, %v529_v13, 0.0 }
 0x233   : > { %532 = vadd.xlane.f32.xlu1 %v531_v14 }
 0x2c0   : > { %v533_v15 = vpop.xlane.xlu1 %532 }
 0x2c1   : > { %v534_v16 = vmul.f32 0.03125, %v533_v15 }
 0x2c3   : > { %v535_v17 = vsub.f32 %v529_v13, %v534_v16 }
 0x2c5   : > { %v536_v18 = vmul.f32 %v535_v17, %v535_v17 }
 0x2c7   : > { %v537_v19 = vsel %vm479_vm0, %v536_v18, 0.0 }
 0x2c8   : > { %538 = vadd.xlane.f32.xlu1 %v537_v19 }
 0x355   : > { %v539_v21 = vpop.xlane.xlu1 %538 }
 0x356   : > { %v540_v22 = vmul.f32 0.03125, %v539_v21 }
 0x358   : > { %v541_v23 = vadd.f32 1e-05, %v540_v22 }
 0x35a   : > { %1608 = vrsqrt.f32 %v541_v23 }
 0x364   : > { %v1609_v24 = vpop.eup %1608 }
 0x365   : > { %v543_v26 = vmul.f32 %v1609_v24, %v535_v17  ;;  %v1603_v17 = vld [vmem:[#allocation15 + $0x68] sm:$0xff]  }
 0x366   : > { %1070 = vmatpush1.bf16.msra.mxu1 %v1603_v17  ;;  %v481_v24 = vld [vmem:[%s402_s17] sm:$0xff]  ;;  %s1818_s17 = sshll.u32 %s1961_s16, 4  ;;  %s1819_s17 = int_to_ptr.vmem [resolvable:$false] %s1818_s17 }
 0x367   : > { %v550_v27 = vmul.f32 %v1361_v25, %v543_v26  ;;  %v483_v25 = vsel %vm479_vm0, %v481_v24, 0.0  ;;  %s1820_s4 = scalar_lea.vmem %s1819_s17, 256  ;;  %p1821_p11 = scmp.lt.s32.totalorder %s1133_s14, %s1819_s17 }
 0x368   : > { %p1822_p12 = scmp.lt.s32.totalorder %s1820_s4, %s1814_s13 }
 0x369   : > { %v551_v28 = vpack.c.bf16 %v550_v27, %v550_v27 }
 0x36a   : > { %p1823_p4 = por %p1822_p12, %p1821_p11 }
 0x36b   : > { %v559_v29 = vsel %vm557_vm2, %v551_v28, 0 }
 0x36c   : > { %1418 = vmatpush3.bf16.msra.mxu0 %v559_v29  ;;  %p1824_p6 = pnand %p1823_p4, %p1817_p2 }
 0x36d   : > { %1423 = vmatprep.subr.bf16.mxu0 %v1955_v20 }
 0x36f   : > { %1420 = vmatmul.mubr.msk.bf16.vlgmr.msra.gmra.mrb[0].mxu0 %vm553_vm3, %v552_v30 }
 0x370   : > { %1424 = vmatpush3.bf16.msra.mxu0 %v559_v29  ;;  %1425 = vmatprep.mubr.msk.bf16.mxu0 %vm1956_vm1, %v1955_v20 }
 0x371   : > { %1429 = vmatprep.subr.bf16.mxu0 %v1955_v20 }
 0x377   : > { %1426 = vmatmul.mubr.msk.bf16.vlgmr.msra.gmra.mrb[4].mxu0 %vm553_vm3, %v605_v31 }
 0x378   : > { %1430 = vmatpush3.bf16.msra.mxu0 %v559_v29  ;;  %1431 = vmatprep.mubr.msk.bf16.mxu0 %vm1956_vm1, %v1955_v20 }
 0x379   : > { %1435 = vmatprep.subr.bf16.mxu0 %v1955_v20 }
 0x37f   : > { %1432 = vmatmul.mubr.msk.bf16.vlgmr.msra.gmra.mrb[8].mxu0 %vm553_vm3, %v659_v32 }
 0x380   : > { %1436 = vmatpush3.bf16.msra.mxu0 %v559_v29  ;;  %1437 = vmatprep.mubr.msk.bf16.mxu0 %vm1956_vm1, %v1955_v20 }
 0x381   : > { %1441 = vmatprep.subr.bf16.mxu0 %v1955_v20 }
 0x387   : > { %1438 = vmatmul.mubr.msk.bf16.vlgmr.msra.gmra.mrb[12].mxu0 %vm553_vm3, %v713_v33 }
 0x388   : > { %1442 = vmatpush3.bf16.msra.mxu0 %v559_v29  ;;  %1443 = vmatprep.mubr.msk.bf16.mxu0 %vm1956_vm1, %v1955_v20 }
 0x389   : > { %1447 = vmatprep.subr.bf16.mxu0 %v1955_v20 }
 0x38f   : > { %1444 = vmatmul.mubr.msk.bf16.vlgmr.msra.gmra.mrb[16].mxu0 %vm553_vm3, %v767_v34  ;;  %v919_v34 = vld [vmem:[#allocation2] sm:$0xff] }
 0x390   : > { %1448 = vmatpush3.bf16.msra.mxu0 %v559_v29  ;;  %1449 = vmatprep.mubr.msk.bf16.mxu0 %vm1956_vm1, %v1955_v20 }
 0x391   : > { %1453 = vmatprep.subr.bf16.mxu0 %v1955_v20 }
 0x397   : > { %1450 = vmatmul.mubr.msk.bf16.vlgmr.msra.gmra.mrb[20].mxu0 %vm553_vm3, %v814_v35 }
 0x398   : > { %1454 = vmatpush3.bf16.msra.mxu0 %v559_v29  ;;  %1455 = vmatprep.mubr.msk.bf16.mxu0 %vm1956_vm1, %v1955_v20 }
 0x39f   : > { %1456 = vmatmul.mubr.msk.bf16.vlgmr.msra.gmra.mrb[24].mxu0 %vm553_vm3, %v867_v36 }
 0x442   : > { %v595_v41 = vpop.f32.mrb[0].mxu0 }
 0x443   : > { %v601_v43 = vpack.c.bf16 %v595_v41, %v595_v41  ;;  %v1421_v44 = vpop.f32.mrb[1].mxu0 }
 0x444   : > { %v598_v45 = vpop.f32.mrb[2].mxu0 }
 0x445   : > { %603 = vst.msk [vmem:[#allocation3] sm:$0xf] %vm602_vm4, %v601_v43  ;;  %v1422_v46 = vpop.f32.mrb[3].mxu0 }
 0x44a   : > { %v643_v48 = vpop.f32.mrb[4].mxu0 }
 0x44b   : > { %v1398_v50 = vpack.c.bf16 %v643_v48, %v643_v48  ;;  %v1427_v51 = vpop.f32.mrb[5].mxu0 }
 0x44c   : > { %v646_v52 = vpop.f32.mrb[6].mxu0 }
 0x44d   : > { %v1428_v53 = vpop.f32.mrb[7].mxu0  ;;  %653 = vrot.lane.b32.xlu0 %v1398_v50, %s1958_s11 }
 0x452   : > { %v697_v55 = vpop.f32.mrb[8].mxu0 }
 0x453   : > { %v1399_v57 = vpack.c.bf16 %v697_v55, %v697_v55  ;;  %v1433_v58 = vpop.f32.mrb[9].mxu0 }
 0x454   : > { %v700_v59 = vpop.f32.mrb[10].mxu0 }
 0x455   : > { %v1434_v60 = vpop.f32.mrb[11].mxu0  ;;  %707 = vrot.lane.b32.xlu1 %v1399_v57, %s1959_s20 }
 0x45a   : > { %v751_v62 = vpop.f32.mrb[12].mxu0 }
 0x45b   : > { %v1439_v63 = vpop.f32.mrb[13].mxu0  ;;  %v1400_v18 = vpack.c.bf16 %v751_v62, %v751_v62 }
 0x45c   : > { %v754_v0 = vpop.f32.mrb[14].mxu0 }
 0x45d   : > { %v1440_v1 = vpop.f32.mrb[15].mxu0 }
 0x462   : > { %v805_v3 = vpop.f32.mrb[16].mxu0 }
 0x463   : > { %v811_v4 = vpack.c.bf16 %v805_v3, %v805_v3  ;;  %v1445_v5 = vpop.f32.mrb[17].mxu0 }
 0x464   : > { %v808_v7 = vpop.f32.mrb[18].mxu0 }
 0x465   : > { %812 = vst.msk [vmem:[#allocation3 + $0x4] sm:$0xf] %vm602_vm4, %v811_v4  ;;  %v1446_v8 = vpop.f32.mrb[19].mxu0 }
 0x46a   : > { %v852_v12 = vpop.f32.mrb[20].mxu0 }
 0x46b   : > { %v1401_v13 = vpack.c.bf16 %v852_v12, %v852_v12  ;;  %v1451_v14 = vpop.f32.mrb[21].mxu0 }
 0x46c   : > { %v855_v15 = vpop.f32.mrb[22].mxu0 }
 0x46d   : > { %862 = vrot.lane.b32.xlu1 %v1401_v13, %s1958_s11  ;;  %v1452_v16 = vpop.f32.mrb[23].mxu0 }
 0x471   : > { %761 = vrot.lane.b32.xlu1 %v1400_v18, %s1960_s5 }
 0x472   : > { %v905_v19 = vpop.f32.mrb[24].mxu0 }
 0x473   : > { %v1402_v20 = vpack.c.bf16 %v905_v19, %v905_v19  ;;  %v1457_v21 = vpop.f32.mrb[25].mxu0 }
 0x474   : > { %v908_v22 = vpop.f32.mrb[26].mxu0 }
 0x475   : > { %915 = vrot.lane.b32.xlu0 %v1402_v20, %s1959_s20  ;;  %v1458_v23 = vpop.f32.mrb[27].mxu0 }
 0x495   : > { %484 = vadd.xlane.f32.xlu1 %v483_v25 }
 0x4bf   : > { %v654_v26 = vpop.permute.xlu0 %653 }
 0x4c0   : > { %657 = vst.msk [vmem:[#allocation3] sm:$0xf] %vm656_vm5, %v654_v26 }
 0x4c7   : > { %v708_v27 = vpop.permute.xlu1 %707 }
 0x4c8   : > { %711 = vst.msk [vmem:[#allocation3] sm:$0xf] %vm710_vm6, %v708_v27 }
 0x4df   : > { %v863_v28 = vpop.permute.xlu1 %862 }
 0x4e0   : > { %865 = vst.msk [vmem:[#allocation3 + $0x4] sm:$0xf] %vm656_vm5, %v863_v28 }
 0x4e3   : > { %v762_v29 = vpop.permute.xlu1 %761 }
 0x4e4   : > { %765 = vst.msk [vmem:[#allocation3] sm:$0xf] %vm764_vm7, %v762_v29 }
 0x4e7   : > { %v916_v30 = vpop.permute.xlu0 %915 }
 0x4e8   : > { %918 = vst.msk [vmem:[#allocation3 + $0x4] sm:$0xf] %vm710_vm6, %v916_v30 }
 0x4ef   : > { %v920_v31 = vld [vmem:[#allocation3] sm:$0xff] }
 0x4f0   : > { %v1374_v32 = vcombine.low %v920_v31, %v920_v31  ;;  %v1375_v33 = vcombine.high %v920_v31, %v920_v31 }
 0x4f2   : > { %1390 = vmatprep.mubr.msk.bf16.mxu1 %vm1039_vm8, %v1375_v33 }
 0x4f3   : > { %1076 = vmatmul.mubr.bf16.vlgmr.msra.gmra.mrb[0].mxu1 %v1374_v32 }
 0x522   : > { %v485_v35 = vpop.xlane.xlu1 %484 }
 0x523   : > { %v487_v39 = vmul.f32 0.03125, %v485_v35 }
 0x525   : > { %v488_v42 = vsub.f32 %v481_v24, %v487_v39 }
 0x527   : > { %v489_v43 = vmul.f32 %v488_v42, %v488_v42 }
 0x529   : > { %v490_v46 = vsel %vm479_vm0, %v489_v43, 0.0 }
 0x5c6   : > { %v1077_v36 = vpop.f32.mrb[0].mxu1 }
 0x5c7   : > { %v1083_v37 = vadd.f32 %v1077_v36, %v919_v34  ;;  %v1079_v38 = vpop.f32.mrb[1].mxu1 }
 0x5c8   : > { %v1080_v40 = vpop.f32.mrb[2].mxu1 }
 0x5c9   : > { %1084 = vst.msk [vmem:[#allocation2] sm:$0xff] %vm479_vm0, %v1083_v37  ;;  %v1081_v41 = vpop.f32.mrb[3].mxu1 }
 0x5d0   : > { %v1088_v44 = vld [vmem:[#allocation2] sm:$0xff] }
 0x5d1   : > { %v1090_v45 = vsel %vm479_vm0, %v1088_v44, 0.0 }
 0x5d2   : > { %1091 = vadd.xlane.f32.xlu0 %v1090_v45 }
 0x5d6   : > { %491 = vadd.xlane.f32.xlu0 %v490_v46 }
 0x65f   : > { %v1092_v47 = vpop.xlane.xlu0 %1091 }
 0x660   : > { %v1093_v48 = vmul.f32 0.03125, %v1092_v47 }
 0x662   : > { %v1094_v49 = vsub.f32 %v1088_v44, %v1093_v48 }
 0x663   : > { %v492_v50 = vpop.xlane.xlu0 %491 }
 0x664   : > { %v493_v51 = vmul.f32 0.03125, %v492_v50  ;;  %v1095_v52 = vmul.f32 %v1094_v49, %v1094_v49 }
 0x666   : > { %v494_v53 = vadd.f32 1e-05, %v493_v51  ;;  %v1096_v54 = vsel %vm479_vm0, %v1095_v52, 0.0 }
 0x667   : > { %1097 = vadd.xlane.f32.xlu0 %v1096_v54 }
 0x668   : > { %1610 = vrsqrt.f32 %v494_v53 }
 0x672   : > { %v1611_v55 = vpop.eup %1610 }
 0x673   : > { %v496_v56 = vmul.f32 %v1611_v55, %v488_v42 }
 0x675   : > { %v503_v57 = vmul.f32 %v2314_v11, %v496_v56 }
 0x677   : > { %v504_v58 = vadd.f32 %v503_v57, %v481_v24 }
 0x679   : > { %505 = vst.msk [vmem:[%s466_s2] sm:$0xff] %vm479_vm0, %v504_v58 }
 0x67a   : > { %1827 = shalt.err (!%p1824_p6)
}
 0x67b   : > { %s1828_s12 = scalar_lea.hbm %s2368_s23, 128  ;;  %s1832_s11 = scalar_lea.hbm %s2487_s6, 256 }
 0x67c   : > { %p1829_p5 = scmp.ne.s32.totalorder %s2368_s23, %s1828_s12  ;;  %p1833_p8 = scmp.lt.u32.totalorder %s2368_s23, %s2487_s6 }
 0x67d   : > { %p1834_p9 = scmp.lt.u32.totalorder %s1832_s11, %s1828_s12  ;;  %p1836_p3 = scmp.lt.u32.totalorder %s1828_s12, %s2368_s23 }
 0x67e   : > { %p1830_p7 = pnand %p1829_p5, %p2488_p10 }
 0x67f   : > { %p1835_p1 = por %p1834_p9, %p1833_p8 }
 0x680   : > { %p1831_p0 = pneg %p1830_p7 }
 0x681   : > { %p1837_p13 = por %p1836_p3, %p1835_p1 }
 0x683   : > { %p1838_p2 = pnand %p1837_p13, %p1831_p0 }
 0x685   : > { %1841 = shalt.err (!%p1838_p2)
}
 0x686   : > { %1483 = dma.vmem_to_hbm [thread:$0]  (%p2488_p10), %s1133_s14, 128, %s2368_s23, %s1113_s26   ;;  %v1391_v62 = vld [vmem:[#allocation12] ss:$0 sm:$0xff] }
 0x687   : > { %s1358_s2 = sshll.u32 %s2283_s18, 2  ;;  %s1395_s8 = sshll.u32 %s1936_s30, 6 }
 0x688   : > { %s473_s24 = scalar_lea.vmem [#allocation17], %s1358_s2  ;;  %s2489_s17 = sld [smem:[#allocation32_spill]] }
 0x689   : > { %s1146_s22 = sshll.u32 %s473_s24, 4  ;;  %s1118_s23 = scalar_lea.sflag [#allocation18], %s2283_s18  ;;  %s2395_s22 = int_to_ptr.vmem [resolvable:$true] %s1146_s22 }
 0x68a   : > { %s1842_s14 = scalar_lea.vmem %s2395_s22, 64  ;;  %s1962_s30 = smov [#allocation17]  }
 0x68b   : > { %p1843_p11 = scmp.ne.s32.totalorder %s2395_s22, %s1842_s14  ;;  %s1846_s26 = sshll.u32 %s1962_s30, 4  ;;  %s1847_s26 = int_to_ptr.vmem [resolvable:$false] %s1846_s26 }
 0x68c   : > { %s1848_s12 = scalar_lea.vmem %s1847_s26, 128  ;;  %p1849_p6 = scmp.lt.s32.totalorder %s2395_s22, %s1847_s26 }
 0x68d   : > { %p1844_p12 = pnand %p1843_p11, %p2488_p10  ;;  %p1850_p5 = scmp.lt.s32.totalorder %s1848_s12, %s1842_s14 }
 0x68e   : > { %s2393_s4 = scalar_lea.hbm %s2489_s17, %s1395_s8 }
 0x68f   : > { %p1845_p4 = pneg %p1844_p12  ;;  %p1851_p7 = por %p1850_p5, %p1849_p6 }
 0x691   : > { %p1852_p0 = pnand %p1851_p7, %p1845_p4 }
 0x6f4   : > { %v1098_v11 = vpop.xlane.xlu0 %1097 }
 0x6f5   : > { %v1099_v59 = vmul.f32 0.03125, %v1098_v11 }
 0x6f7   : > { %v1100_v60 = vadd.f32 1e-05, %v1099_v59 }
 0x6f9   : > { %1612 = vrsqrt.f32 %v1100_v60 }
 0x703   : > { %v1613_v61 = vpop.eup %1612 }
 0x704   : > { %v1102_v63 = vmul.f32 %v1613_v61, %v1094_v49 }
 0x706   : > { %v1109_v0 = vmul.f32 %v1391_v62, %v1102_v63 }
 0x708   : > { %v1110_v1 = vpack.c.bf16 %v1109_v0, %v1109_v0 }
 0x70a   : > { %1111 = vst.msk [vmem:[%s473_s24] sm:$0xf] %vm602_vm4, %v1110_v1 }
 0x70b   : > { %1855 = shalt.err (!%p1852_p0)
}
 0x70c   : > { %s1856_s18 = scalar_lea.hbm %s2393_s4, 64  ;;  %s1860_s11 = scalar_lea.hbm %s2489_s17, 128 }
 0x70d   : > { %p1857_p8 = scmp.ne.s32.totalorder %s2393_s4, %s1856_s18  ;;  %p1861_p3 = scmp.lt.u32.totalorder %s2393_s4, %s2489_s17 }
 0x70e   : > { %p1862_p13 = scmp.lt.u32.totalorder %s1860_s11, %s1856_s18  ;;  %p1864_p11 = scmp.lt.u32.totalorder %s1856_s18, %s2393_s4 }
 0x70f   : > { %p1858_p9 = pnand %p1857_p8, %p2488_p10 }
 0x710   : > { %p1863_p2 = por %p1862_p13, %p1861_p3 }
 0x711   : > { %p1859_p1 = pneg %p1858_p9 }
 0x712   : > { %p1865_p12 = por %p1864_p11, %p1863_p2 }
 0x714   : > { %p1866_p4 = pnand %p1865_p12, %p1859_p1 }
 0x716   : > { %1869 = shalt.err (!%p1866_p4)
}
 0x717   : > { %1484 = dma.vmem_to_hbm [thread:$0]  (%p2488_p10), %s2395_s22, 64, %s2393_s4, %s1118_s23  }
 0x718 PF: > { %s1158_s2 = sand.u32 1, %s1924_s27   ;;  %p2490_p6 = scmp.ne.s32.totalorder %s2477_s7, 0 }
 0x719   : > { %p2491_p5 = scmp.ge.s32.totalorder %s1944_s10, 2  ;;  %s1159_s8 = scalar_lea.sflag [#allocation6], %s1158_s2 }
 0x71b   : > { %p1511_p7 = pnand %p2491_p5, %p2490_p6 }
 0x71d   : > { %1915 = dma.done.wait (!%p1511_p7), %s1159_s8, 128  }
 0x71e   : > { %1917 = vsyncadd (!%p1511_p7), %s1159_s8, 4294967168  ;;  %s1168_s24 = scalar_lea.sflag [#allocation18], %s1158_s2 }
 0x71f   : > { %1919 = dma.done.wait (!%p1511_p7), %s1168_s24, 64  }
 0x720   : > { %1921 = vsyncadd (!%p1511_p7), %s1168_s24, 4294967232  ;;  %s33_s10 = sadd.s32 1, %s1944_s10   ;;  %s2492_s27 = smov %s1928_s28 }
 0x721   : > { %p30_p0 = scmp.ge.s32.totalorder %s33_s10, 4   ;;  %s2493_s28 = smov %s1932_s29 }
 0x722   : > { %s2494_s29 = smov %s2203_s3  ;;  %s2495_s30 = smov %s1940_s9 }
 0x723   : > { %s2496_s9 = smov %s2498_s25  ;;  %32 = sbr.rel (!%p30_p0) target bundleno = 20 (0x14), region = 158 }
 0x72a   :  { %1173 = vsyncpa [#allocation5], 1 }
 0x72b   :  { %1175 = vsyncpa [#allocation5 + $0x1], 1 }
 0x72c   :  { %1176 = vsyncpa [#allocation8], 1 }
 0x72d   :  { %1178 = vsyncpa [#allocation8 + $0x1], 1 }
 0x72e   :  { %1179 = vsyncpa [#allocation11], 1 }
 0x72f   :  { %1180 = vsyncpa [#allocation14], 1 }
 0x730   :  { %1181 = vsyncpa [#allocation6], 1 }
 0x731   :  { %1183 = vsyncpa [#allocation6 + $0x1], 1 }
 0x732   :  { %1184 = vsyncpa [#allocation18], 1 }
 0x733   :  { %1186 = vsyncpa [#allocation18 + $0x1], 1 }

</bundles_post_ra>
